<compile_context>
chip_gen: v7x
topology: tpu7x:2x2x1
jax: 0.10.0
libtpu: 0.0.40
codegen_flags: <defaults>
</compile_context>

<pallas_src>
import numpy as np
import jax
import jax.numpy as jnp
from jax.experimental import pallas as pl
from jax.experimental.pallas import tpu as pltpu

EPS = 1e-5


def _full_spec(a):
    nd = a.ndim
    return pl.BlockSpec(a.shape, lambda i, nd=nd: (0,) * nd)


def _make_critic_kernel(n_batch, layer_cfgs):
    """Build the fused forward kernel.

    Ref order: x2d (stacked), then per layer
    [gamma, beta, t_red, t_exp, r_all, m_all, bias_lane],
    then head [p_pool, t_head, w_lin, b_lin], then out_ref.
    """

    def kernel(*refs):
        out_ref = refs[-1]
        refs = refs[:-1]
        pos = 0

        # Whole batch as one 2-D slab: [N*Hin, Win*Cin], lanes = (w, c), c fastest.
        x = refs[pos][...].astype(jnp.float32)
        pos += 1

        for cfg in layer_cfgs:
            gamma = refs[pos][...]           # [1, Cin]
            beta = refs[pos + 1][...]        # [1, Cin]
            t_red = refs[pos + 2][...]       # [Win*Cin, Cin]   (sum over w per channel)
            t_exp = refs[pos + 3][...]       # [Cin, Win*Cin]   (expand channel -> lanes)
            r_all_ref = refs[pos + 4]        # [k, N*Hout, N*Hin]   (bf16, block-diag 0/1)
            m_all_ref = refs[pos + 5]        # [k, Win*Cin, Wout*Cout] (bf16)
            bias_lane = refs[pos + 6][...]   # [1, Wout*Cout]
            pos += 7

            count = float(n_batch * cfg["Hin"] * cfg["Win"])

            # ---- BatchNorm2d, training-mode batch stats (biased variance) ----
            col_sum = jnp.sum(x, axis=0, keepdims=True)                    # [1, Win*Cin]
            mean = jnp.dot(col_sum, t_red,
                           preferred_element_type=jnp.float32) / count     # [1, Cin]
            mean_lane = jnp.dot(mean, t_exp, preferred_element_type=jnp.float32)
            cen = x - mean_lane
            sq_sum = jnp.sum(cen * cen, axis=0, keepdims=True)             # [1, Win*Cin]
            var = jnp.dot(sq_sum, t_red,
                          preferred_element_type=jnp.float32) / count      # [1, Cin]
            scale = gamma * jax.lax.rsqrt(var + EPS)                       # [1, Cin]
            shift = beta - mean * scale
            scale_lane = jnp.dot(scale, t_exp, preferred_element_type=jnp.float32)
            shift_lane = jnp.dot(shift, t_exp, preferred_element_type=jnp.float32)

            xbn_bf = (x * scale_lane + shift_lane).astype(jnp.bfloat16)    # [N*Hin, Win*Cin]

            # ---- Conv2d (pad=k//2, stride) + bias + ReLU via per-tap MXU matmuls ----
            acc = None
            for kh in range(cfg["ksz"]):
                rows = jnp.dot(r_all_ref[kh], xbn_bf,
                               preferred_element_type=jnp.float32)         # [N*Hout, Win*Cin]
                part = jnp.dot(rows.astype(jnp.bfloat16), m_all_ref[kh],
                               preferred_element_type=jnp.float32)         # [N*Hout, Wout*Cout]
                acc = part if acc is None else acc + part
            x = jnp.maximum(acc + bias_lane, 0.0)                          # [N*Hout, Wout*Cout]

        # ---- AdaptiveAvgPool2d(1) + Flatten + Linear(C_last, 1) ----
        p_pool = refs[pos][...]          # [N, N*H_last]  (1/(H*W) folded in)
        t_head = refs[pos + 1][...]      # [W_last*C_last, C_last]
        w_lin = refs[pos + 2][...]       # [C_last, 1]
        b_lin = refs[pos + 3][...]       # [1, 1]

        col = jnp.dot(p_pool, x, preferred_element_type=jnp.float32)       # [N, W_last*C_last]
        pooled = jnp.dot(col, t_head, preferred_element_type=jnp.float32)  # [N, C_last]
        out_ref[...] = jnp.dot(pooled, w_lin,
                               preferred_element_type=jnp.float32) + b_lin  # [N, 1]

    return kernel


def init_params(key, channels, kernel_sizes):
    conv_params = []
    for i, k in enumerate(kernel_sizes):
        cin, cout = channels[i], channels[i + 1]
        key, k1, k2, k3, k4 = jax.random.split(key, 5)
        conv_params.append(dict(
            gamma=1.0 + 0.1 * jax.random.normal(k1, (1, cin), jnp.float32),
            beta=0.1 * jax.random.normal(k2, (1, cin), jnp.float32),
            w=jax.random.normal(k3, (k, k, cin, cout), jnp.float32) / jnp.sqrt(k * k * cin),
            b=0.01 * jax.random.normal(k4, (1, cout), jnp.float32),
        ))
    key, k1, k2 = jax.random.split(key, 3)
    lin_params = dict(
        w=jax.random.normal(k1, (channels[-1], 1), jnp.float32) / jnp.sqrt(channels[-1]),
        b=0.01 * jax.random.normal(k2, (1, 1), jnp.float32),
    )
    return conv_params, lin_params


def critic_forward(x_nchw, conv_params, lin_params, kernel_sizes, strides):
    n_batch, c0, h0, w0 = x_nchw.shape

    # NCHW -> batch-stacked 2-D slab: [N*H, W*C] with channel fastest on the lane axis.
    x2d = jnp.transpose(x_nchw, (0, 2, 3, 1)).reshape(n_batch * h0, w0 * c0)

    flat_inputs = [x2d]
    layer_cfgs = []
    h_in, w_in, c_in = h0, w0, c0
    for p, ksz, st in zip(conv_params, kernel_sizes, strides):
        c_out = p["w"].shape[3]
        pad = ksz // 2
        h_out = (h_in + 2 * pad - ksz) // st + 1
        w_out = (w_in + 2 * pad - ksz) // st + 1

        # (w, c) -> c reduction matrix (and its transpose for channel -> lane expansion).
        t_red = np.tile(np.eye(c_in, dtype=np.float32), (w_in, 1))       # [w_in*c_in, c_in]
        t_exp = np.ascontiguousarray(t_red.T)                            # [c_in, w_in*c_in]

        # Row selection + zero padding per kernel row kh (per image), block-diag over batch.
        r_one = np.zeros((ksz, h_out, h_in), np.float32)
        for kh in range(ksz):
            for ho in range(h_out):
                hi = st * ho + kh - pad
                if 0 <= hi < h_in:
                    r_one[kh, ho, hi] = 1.0
        eye_n = np.eye(n_batch, dtype=np.float32)
        r_all = np.stack([np.kron(eye_n, r_one[kh]) for kh in range(ksz)], axis=0)
        # r_all: [ksz, N*h_out, N*h_in], exact 0/1 values -> safe in bf16.

        # Column selection + zero padding + stride folded with the conv weights:
        # M_kh[(wi, ci), (wo, co)] = sum_kw [wi == st*wo + kw - pad] * W[kh, kw, ci, co]
        sel = np.zeros((ksz, w_in, w_out), np.float32)
        for kw in range(ksz):
            for wo in range(w_out):
                wi = st * wo + kw - pad
                if 0 <= wi < w_in:
                    sel[kw, wi, wo] = 1.0
        m_all = jnp.einsum("kwv,hkcd->hwcvd", jnp.asarray(sel), p["w"])
        m_all = m_all.reshape(ksz, w_in * c_in, w_out * c_out).astype(jnp.bfloat16)

        bias_lane = jnp.tile(p["b"].reshape(1, c_out), (1, w_out))       # [1, w_out*c_out]

        flat_inputs += [p["gamma"], p["beta"],
                        jnp.asarray(t_red), jnp.asarray(t_exp),
                        jnp.asarray(r_all, dtype=jnp.bfloat16), m_all, bias_lane]
        layer_cfgs.append(dict(Hin=h_in, Win=w_in, Cin=c_in,
                               Hout=h_out, Wout=w_out, Cout=c_out, ksz=ksz))
        h_in, w_in, c_in = h_out, w_out, c_out

    # Head constants: AdaptiveAvgPool2d(1) -> Flatten -> Linear(c_last, 1)
    p_pool = np.kron(np.eye(n_batch, dtype=np.float32),
                     np.ones((1, h_in), np.float32)) / float(h_in * w_in)  # [N, N*h_in]
    t_head = np.tile(np.eye(c_in, dtype=np.float32), (w_in, 1))            # [w_in*c_in, c_in]
    flat_inputs += [jnp.asarray(p_pool), jnp.asarray(t_head),
                    lin_params["w"], lin_params["b"]]

    kernel = _make_critic_kernel(n_batch, layer_cfgs)

    return pl.pallas_call(
        kernel,
        out_shape=jax.ShapeDtypeStruct((n_batch, 1), jnp.float32),
        grid=(1,),
        in_specs=[_full_spec(a) for a in flat_inputs],
        out_specs=pl.BlockSpec((n_batch, 1), lambda i: (0, 0)),
        compiler_params=pltpu.CompilerParams(dimension_semantics=("arbitrary",)),
    )(*flat_inputs)

# TODO(synk): AdamW optimizer / training_step / loss backward are training-time
#             machinery, not part of the forward pass, and are not implemented.


if __name__ == "__main__":
    hparams = dict(channels=[4, 8, 16], kernel_sizes=[3, 3], strides=[1, 2],
                   lr=1e-3, wd=1e-2)

    key = jax.random.PRNGKey(0)
    key, kx, kp = jax.random.split(key, 3)
    # Matches PyTorch NCHW input convention: [batch=2, channels=4, 16, 16]
    x = jax.random.normal(kx, (2, 4, 16, 16), jnp.float32)

    conv_params, lin_params = init_params(kp, hparams["channels"],
                                          hparams["kernel_sizes"])

    out = critic_forward(x, conv_params, lin_params,
                         hparams["kernel_sizes"], hparams["strides"])
    out = jax.block_until_ready(out)
    assert out.shape == (2, 1), out.shape
    assert out.dtype == jnp.float32
    print("KERNEL_OK")
</pallas_src>

<mosaic_0001>
module attributes {stable_mosaic.version = 11 : i64} {
  func.func @kernel(%arg0: i32, %arg1: memref<32x64xf32, #tpu.memory_space<vmem>>, %arg2: memref<1x4xf32, #tpu.memory_space<vmem>>, %arg3: memref<1x4xf32, #tpu.memory_space<vmem>>, %arg4: memref<64x4xf32, #tpu.memory_space<vmem>>, %arg5: memref<4x64xf32, #tpu.memory_space<vmem>>, %arg6: memref<3x32x32xbf16, #tpu.memory_space<vmem>>, %arg7: memref<3x64x128xbf16, #tpu.memory_space<vmem>>, %arg8: memref<1x128xf32, #tpu.memory_space<vmem>>, %arg9: memref<1x8xf32, #tpu.memory_space<vmem>>, %arg10: memref<1x8xf32, #tpu.memory_space<vmem>>, %arg11: memref<128x8xf32, #tpu.memory_space<vmem>>, %arg12: memref<8x128xf32, #tpu.memory_space<vmem>>, %arg13: memref<3x16x32xbf16, #tpu.memory_space<vmem>>, %arg14: memref<3x128x128xbf16, #tpu.memory_space<vmem>>, %arg15: memref<1x128xf32, #tpu.memory_space<vmem>>, %arg16: memref<2x16xf32, #tpu.memory_space<vmem>>, %arg17: memref<128x16xf32, #tpu.memory_space<vmem>>, %arg18: memref<16x1xf32, #tpu.memory_space<vmem>>, %arg19: memref<1x1xf32, #tpu.memory_space<vmem>>, %arg20: memref<2x1xf32, #tpu.memory_space<vmem>>) attributes {dimension_semantics = [#tpu.dimension_semantics<arbitrary>], iteration_bounds = array<i64: 1>, scalar_prefetch = 0 : i64, scratch_operands = 0 : i64, tpu.core_type = #tpu.core_type<tc>, window_params = [{pipeline_mode = #tpu.pipeline_mode<synchronous>, transform_indices = @transform_0, window_bounds = array<i64: 32, 64>}, {pipeline_mode = #tpu.pipeline_mode<synchronous>, transform_indices = @transform_1, window_bounds = array<i64: 1, 4>}, {pipeline_mode = #tpu.pipeline_mode<synchronous>, transform_indices = @transform_2, window_bounds = array<i64: 1, 4>}, {pipeline_mode = #tpu.pipeline_mode<synchronous>, transform_indices = @transform_3, window_bounds = array<i64: 64, 4>}, {pipeline_mode = #tpu.pipeline_mode<synchronous>, transform_indices = @transform_4, window_bounds = array<i64: 4, 64>}, {pipeline_mode = #tpu.pipeline_mode<synchronous>, transform_indices = @transform_5, window_bounds = array<i64: 3, 32, 32>}, {pipeline_mode = #tpu.pipeline_mode<synchronous>, transform_indices = @transform_6, window_bounds = array<i64: 3, 64, 128>}, {pipeline_mode = #tpu.pipeline_mode<synchronous>, transform_indices = @transform_7, window_bounds = array<i64: 1, 128>}, {pipeline_mode = #tpu.pipeline_mode<synchronous>, transform_indices = @transform_8, window_bounds = array<i64: 1, 8>}, {pipeline_mode = #tpu.pipeline_mode<synchronous>, transform_indices = @transform_9, window_bounds = array<i64: 1, 8>}, {pipeline_mode = #tpu.pipeline_mode<synchronous>, transform_indices = @transform_10, window_bounds = array<i64: 128, 8>}, {pipeline_mode = #tpu.pipeline_mode<synchronous>, transform_indices = @transform_11, window_bounds = array<i64: 8, 128>}, {pipeline_mode = #tpu.pipeline_mode<synchronous>, transform_indices = @transform_12, window_bounds = array<i64: 3, 16, 32>}, {pipeline_mode = #tpu.pipeline_mode<synchronous>, transform_indices = @transform_13, window_bounds = array<i64: 3, 128, 128>}, {pipeline_mode = #tpu.pipeline_mode<synchronous>, transform_indices = @transform_14, window_bounds = array<i64: 1, 128>}, {pipeline_mode = #tpu.pipeline_mode<synchronous>, transform_indices = @transform_15, window_bounds = array<i64: 2, 16>}, {pipeline_mode = #tpu.pipeline_mode<synchronous>, transform_indices = @transform_16, window_bounds = array<i64: 128, 16>}, {pipeline_mode = #tpu.pipeline_mode<synchronous>, transform_indices = @transform_17, window_bounds = array<i64: 16, 1>}, {pipeline_mode = #tpu.pipeline_mode<synchronous>, transform_indices = @transform_18, window_bounds = array<i64: 1, 1>}, {pipeline_mode = #tpu.pipeline_mode<synchronous>, transform_indices = @transform_19, window_bounds = array<i64: 2, 1>}]} {
    %c0 = arith.constant 0 : index
    %c0_0 = arith.constant 0 : index
    %0 = vector.load %arg1[%c0, %c0_0] : memref<32x64xf32, #tpu.memory_space<vmem>>, vector<32x64xf32>
    %c0_1 = arith.constant 0 : index
    %c0_2 = arith.constant 0 : index
    %1 = vector.load %arg2[%c0_1, %c0_2] : memref<1x4xf32, #tpu.memory_space<vmem>>, vector<1x4xf32>
    %c0_3 = arith.constant 0 : index
    %c0_4 = arith.constant 0 : index
    %2 = vector.load %arg3[%c0_3, %c0_4] : memref<1x4xf32, #tpu.memory_space<vmem>>, vector<1x4xf32>
    %c0_5 = arith.constant 0 : index
    %c0_6 = arith.constant 0 : index
    %3 = vector.load %arg4[%c0_5, %c0_6] : memref<64x4xf32, #tpu.memory_space<vmem>>, vector<64x4xf32>
    %c0_7 = arith.constant 0 : index
    %c0_8 = arith.constant 0 : index
    %4 = vector.load %arg5[%c0_7, %c0_8] : memref<4x64xf32, #tpu.memory_space<vmem>>, vector<4x64xf32>
    %c0_9 = arith.constant 0 : index
    %c0_10 = arith.constant 0 : index
    %5 = vector.load %arg8[%c0_9, %c0_10] : memref<1x128xf32, #tpu.memory_space<vmem>>, vector<1x128xf32>
    %cst = arith.constant dense<0.000000e+00> : vector<64xf32>
    %6 = vector.multi_reduction <add>, %0, %cst [0] : vector<32x64xf32> to vector<64xf32>
    %7 = vector.shape_cast %6 : vector<64xf32> to vector<1x64xf32>
    %cst_11 = arith.constant dense<0.000000e+00> : vector<1x4xf32>
    %8 = tpu.matmul %7, %3, %cst_11 {dimension_numbers = #tpu.dot_dimension_numbers<[1], [0], [0], [1], [0, 0, 1, 1], [], []>} : vector<1x64xf32>, vector<64x4xf32>, vector<1x4xf32> -> vector<1x4xf32>
    %cst_12 = arith.constant 5.120000e+02 : f32
    %9 = vector.broadcast %cst_12 : f32 to vector<1x4xf32>
    %10 = arith.divf %8, %9 : vector<1x4xf32>
    %cst_13 = arith.constant dense<0.000000e+00> : vector<1x64xf32>
    %11 = tpu.matmul %10, %4, %cst_13 {dimension_numbers = #tpu.dot_dimension_numbers<[1], [0], [0], [1], [0, 0, 1, 1], [], []>} : vector<1x4xf32>, vector<4x64xf32>, vector<1x64xf32> -> vector<1x64xf32>
    %12 = vector.broadcast %11 : vector<1x64xf32> to vector<32x64xf32>
    %13 = arith.subf %0, %12 : vector<32x64xf32>
    %14 = arith.mulf %13, %13 : vector<32x64xf32>
    %cst_14 = arith.constant dense<0.000000e+00> : vector<64xf32>
    %15 = vector.multi_reduction <add>, %14, %cst_14 [0] : vector<32x64xf32> to vector<64xf32>
    %16 = vector.shape_cast %15 : vector<64xf32> to vector<1x64xf32>
    %cst_15 = arith.constant dense<0.000000e+00> : vector<1x4xf32>
    %17 = tpu.matmul %16, %3, %cst_15 {dimension_numbers = #tpu.dot_dimension_numbers<[1], [0], [0], [1], [0, 0, 1, 1], [], []>} : vector<1x64xf32>, vector<64x4xf32>, vector<1x4xf32> -> vector<1x4xf32>
    %cst_16 = arith.constant 5.120000e+02 : f32
    %18 = vector.broadcast %cst_16 : f32 to vector<1x4xf32>
    %19 = arith.divf %17, %18 : vector<1x4xf32>
    %cst_17 = arith.constant 9.99999974E-6 : f32
    %20 = vector.broadcast %cst_17 : f32 to vector<1x4xf32>
    %21 = arith.addf %19, %20 : vector<1x4xf32>
    %22 = math.rsqrt %21 : vector<1x4xf32>
    %23 = arith.mulf %1, %22 : vector<1x4xf32>
    %24 = arith.mulf %10, %23 : vector<1x4xf32>
    %25 = arith.subf %2, %24 : vector<1x4xf32>
    %cst_18 = arith.constant dense<0.000000e+00> : vector<1x64xf32>
    %26 = tpu.matmul %23, %4, %cst_18 {dimension_numbers = #tpu.dot_dimension_numbers<[1], [0], [0], [1], [0, 0, 1, 1], [], []>} : vector<1x4xf32>, vector<4x64xf32>, vector<1x64xf32> -> vector<1x64xf32>
    %cst_19 = arith.constant dense<0.000000e+00> : vector<1x64xf32>
    %27 = tpu.matmul %25, %4, %cst_19 {dimension_numbers = #tpu.dot_dimension_numbers<[1], [0], [0], [1], [0, 0, 1, 1], [], []>} : vector<1x4xf32>, vector<4x64xf32>, vector<1x64xf32> -> vector<1x64xf32>
    %28 = vector.broadcast %26 : vector<1x64xf32> to vector<32x64xf32>
    %29 = arith.mulf %0, %28 : vector<32x64xf32>
    %30 = vector.broadcast %27 : vector<1x64xf32> to vector<32x64xf32>
    %31 = arith.addf %29, %30 : vector<32x64xf32>
    %32 = arith.truncf %31 : vector<32x64xf32> to vector<32x64xbf16>
    %c0_20 = arith.constant 0 : index
    %c0_21 = arith.constant 0 : index
    %c0_22 = arith.constant 0 : index
    %33 = vector.load %arg6[%c0_20, %c0_21, %c0_22] : memref<3x32x32xbf16, #tpu.memory_space<vmem>>, vector<1x32x32xbf16>
    %34 = vector.shape_cast %33 : vector<1x32x32xbf16> to vector<32x32xbf16>
    %cst_23 = arith.constant dense<0.000000e+00> : vector<32x64xf32>
    %35 = tpu.matmul %34, %32, %cst_23 {dimension_numbers = #tpu.dot_dimension_numbers<[1], [0], [0], [1], [0, 0, 1, 1], [], []>} : vector<32x32xbf16>, vector<32x64xbf16>, vector<32x64xf32> -> vector<32x64xf32>
    %36 = arith.truncf %35 : vector<32x64xf32> to vector<32x64xbf16>
    %c0_24 = arith.constant 0 : index
    %c0_25 = arith.constant 0 : index
    %c0_26 = arith.constant 0 : index
    %37 = vector.load %arg7[%c0_24, %c0_25, %c0_26] : memref<3x64x128xbf16, #tpu.memory_space<vmem>>, vector<1x64x128xbf16>
    %38 = vector.shape_cast %37 : vector<1x64x128xbf16> to vector<64x128xbf16>
    %cst_27 = arith.constant dense<0.000000e+00> : vector<32x128xf32>
    %39 = tpu.matmul %36, %38, %cst_27 {dimension_numbers = #tpu.dot_dimension_numbers<[1], [0], [0], [1], [0, 0, 1, 1], [], []>} : vector<32x64xbf16>, vector<64x128xbf16>, vector<32x128xf32> -> vector<32x128xf32>
    %c1 = arith.constant 1 : index
    %c0_28 = arith.constant 0 : index
    %c0_29 = arith.constant 0 : index
    %40 = vector.load %arg6[%c1, %c0_28, %c0_29] : memref<3x32x32xbf16, #tpu.memory_space<vmem>>, vector<1x32x32xbf16>
    %41 = vector.shape_cast %40 : vector<1x32x32xbf16> to vector<32x32xbf16>
    %cst_30 = arith.constant dense<0.000000e+00> : vector<32x64xf32>
    %42 = tpu.matmul %41, %32, %cst_30 {dimension_numbers = #tpu.dot_dimension_numbers<[1], [0], [0], [1], [0, 0, 1, 1], [], []>} : vector<32x32xbf16>, vector<32x64xbf16>, vector<32x64xf32> -> vector<32x64xf32>
    %43 = arith.truncf %42 : vector<32x64xf32> to vector<32x64xbf16>
    %c1_31 = arith.constant 1 : index
    %c0_32 = arith.constant 0 : index
    %c0_33 = arith.constant 0 : index
    %44 = vector.load %arg7[%c1_31, %c0_32, %c0_33] : memref<3x64x128xbf16, #tpu.memory_space<vmem>>, vector<1x64x128xbf16>
    %45 = vector.shape_cast %44 : vector<1x64x128xbf16> to vector<64x128xbf16>
    %cst_34 = arith.constant dense<0.000000e+00> : vector<32x128xf32>
    %46 = tpu.matmul %43, %45, %cst_34 {dimension_numbers = #tpu.dot_dimension_numbers<[1], [0], [0], [1], [0, 0, 1, 1], [], []>} : vector<32x64xbf16>, vector<64x128xbf16>, vector<32x128xf32> -> vector<32x128xf32>
    %47 = arith.addf %39, %46 : vector<32x128xf32>
    %c2 = arith.constant 2 : index
    %c0_35 = arith.constant 0 : index
    %c0_36 = arith.constant 0 : index
    %48 = vector.load %arg6[%c2, %c0_35, %c0_36] : memref<3x32x32xbf16, #tpu.memory_space<vmem>>, vector<1x32x32xbf16>
    %49 = vector.shape_cast %48 : vector<1x32x32xbf16> to vector<32x32xbf16>
    %cst_37 = arith.constant dense<0.000000e+00> : vector<32x64xf32>
    %50 = tpu.matmul %49, %32, %cst_37 {dimension_numbers = #tpu.dot_dimension_numbers<[1], [0], [0], [1], [0, 0, 1, 1], [], []>} : vector<32x32xbf16>, vector<32x64xbf16>, vector<32x64xf32> -> vector<32x64xf32>
    %51 = arith.truncf %50 : vector<32x64xf32> to vector<32x64xbf16>
    %c2_38 = arith.constant 2 : index
    %c0_39 = arith.constant 0 : index
    %c0_40 = arith.constant 0 : index
    %52 = vector.load %arg7[%c2_38, %c0_39, %c0_40] : memref<3x64x128xbf16, #tpu.memory_space<vmem>>, vector<1x64x128xbf16>
    %53 = vector.shape_cast %52 : vector<1x64x128xbf16> to vector<64x128xbf16>
    %cst_41 = arith.constant dense<0.000000e+00> : vector<32x128xf32>
    %54 = tpu.matmul %51, %53, %cst_41 {dimension_numbers = #tpu.dot_dimension_numbers<[1], [0], [0], [1], [0, 0, 1, 1], [], []>} : vector<32x64xbf16>, vector<64x128xbf16>, vector<32x128xf32> -> vector<32x128xf32>
    %55 = arith.addf %47, %54 : vector<32x128xf32>
    %56 = vector.broadcast %5 : vector<1x128xf32> to vector<32x128xf32>
    %57 = arith.addf %55, %56 : vector<32x128xf32>
    %cst_42 = arith.constant 0.000000e+00 : f32
    %58 = vector.broadcast %cst_42 : f32 to vector<32x128xf32>
    %59 = arith.maximumf %57, %58 : vector<32x128xf32>
    %c0_43 = arith.constant 0 : index
    %c0_44 = arith.constant 0 : index
    %60 = vector.load %arg9[%c0_43, %c0_44] : memref<1x8xf32, #tpu.memory_space<vmem>>, vector<1x8xf32>
    %c0_45 = arith.constant 0 : index
    %c0_46 = arith.constant 0 : index
    %61 = vector.load %arg10[%c0_45, %c0_46] : memref<1x8xf32, #tpu.memory_space<vmem>>, vector<1x8xf32>
    %c0_47 = arith.constant 0 : index
    %c0_48 = arith.constant 0 : index
    %62 = vector.load %arg11[%c0_47, %c0_48] : memref<128x8xf32, #tpu.memory_space<vmem>>, vector<128x8xf32>
    %c0_49 = arith.constant 0 : index
    %c0_50 = arith.constant 0 : index
    %63 = vector.load %arg12[%c0_49, %c0_50] : memref<8x128xf32, #tpu.memory_space<vmem>>, vector<8x128xf32>
    %c0_51 = arith.constant 0 : index
    %c0_52 = arith.constant 0 : index
    %64 = vector.load %arg15[%c0_51, %c0_52] : memref<1x128xf32, #tpu.memory_space<vmem>>, vector<1x128xf32>
    %cst_53 = arith.constant dense<0.000000e+00> : vector<128xf32>
    %65 = vector.multi_reduction <add>, %59, %cst_53 [0] : vector<32x128xf32> to vector<128xf32>
    %66 = vector.shape_cast %65 : vector<128xf32> to vector<1x128xf32>
    %cst_54 = arith.constant dense<0.000000e+00> : vector<1x8xf32>
    %67 = tpu.matmul %66, %62, %cst_54 {dimension_numbers = #tpu.dot_dimension_numbers<[1], [0], [0], [1], [0, 0, 1, 1], [], []>} : vector<1x128xf32>, vector<128x8xf32>, vector<1x8xf32> -> vector<1x8xf32>
    %cst_55 = arith.constant 5.120000e+02 : f32
    %68 = vector.broadcast %cst_55 : f32 to vector<1x8xf32>
    %69 = arith.divf %67, %68 : vector<1x8xf32>
    %cst_56 = arith.constant dense<0.000000e+00> : vector<1x128xf32>
    %70 = tpu.matmul %69, %63, %cst_56 {dimension_numbers = #tpu.dot_dimension_numbers<[1], [0], [0], [1], [0, 0, 1, 1], [], []>} : vector<1x8xf32>, vector<8x128xf32>, vector<1x128xf32> -> vector<1x128xf32>
    %71 = vector.broadcast %70 : vector<1x128xf32> to vector<32x128xf32>
    %72 = arith.subf %59, %71 : vector<32x128xf32>
    %73 = arith.mulf %72, %72 : vector<32x128xf32>
    %cst_57 = arith.constant dense<0.000000e+00> : vector<128xf32>
    %74 = vector.multi_reduction <add>, %73, %cst_57 [0] : vector<32x128xf32> to vector<128xf32>
    %75 = vector.shape_cast %74 : vector<128xf32> to vector<1x128xf32>
    %cst_58 = arith.constant dense<0.000000e+00> : vector<1x8xf32>
    %76 = tpu.matmul %75, %62, %cst_58 {dimension_numbers = #tpu.dot_dimension_numbers<[1], [0], [0], [1], [0, 0, 1, 1], [], []>} : vector<1x128xf32>, vector<128x8xf32>, vector<1x8xf32> -> vector<1x8xf32>
    %cst_59 = arith.constant 5.120000e+02 : f32
    %77 = vector.broadcast %cst_59 : f32 to vector<1x8xf32>
    %78 = arith.divf %76, %77 : vector<1x8xf32>
    %cst_60 = arith.constant 9.99999974E-6 : f32
    %79 = vector.broadcast %cst_60 : f32 to vector<1x8xf32>
    %80 = arith.addf %78, %79 : vector<1x8xf32>
    %81 = math.rsqrt %80 : vector<1x8xf32>
    %82 = arith.mulf %60, %81 : vector<1x8xf32>
    %83 = arith.mulf %69, %82 : vector<1x8xf32>
    %84 = arith.subf %61, %83 : vector<1x8xf32>
    %cst_61 = arith.constant dense<0.000000e+00> : vector<1x128xf32>
    %85 = tpu.matmul %82, %63, %cst_61 {dimension_numbers = #tpu.dot_dimension_numbers<[1], [0], [0], [1], [0, 0, 1, 1], [], []>} : vector<1x8xf32>, vector<8x128xf32>, vector<1x128xf32> -> vector<1x128xf32>
    %cst_62 = arith.constant dense<0.000000e+00> : vector<1x128xf32>
    %86 = tpu.matmul %84, %63, %cst_62 {dimension_numbers = #tpu.dot_dimension_numbers<[1], [0], [0], [1], [0, 0, 1, 1], [], []>} : vector<1x8xf32>, vector<8x128xf32>, vector<1x128xf32> -> vector<1x128xf32>
    %87 = vector.broadcast %85 : vector<1x128xf32> to vector<32x128xf32>
    %88 = arith.mulf %59, %87 : vector<32x128xf32>
    %89 = vector.broadcast %86 : vector<1x128xf32> to vector<32x128xf32>
    %90 = arith.addf %88, %89 : vector<32x128xf32>
    %91 = arith.truncf %90 : vector<32x128xf32> to vector<32x128xbf16>
    %c0_63 = arith.constant 0 : index
    %c0_64 = arith.constant 0 : index
    %c0_65 = arith.constant 0 : index
    %92 = vector.load %arg13[%c0_63, %c0_64, %c0_65] : memref<3x16x32xbf16, #tpu.memory_space<vmem>>, vector<1x16x32xbf16>
    %93 = vector.shape_cast %92 : vector<1x16x32xbf16> to vector<16x32xbf16>
    %cst_66 = arith.constant dense<0.000000e+00> : vector<16x128xf32>
    %94 = tpu.matmul %93, %91, %cst_66 {dimension_numbers = #tpu.dot_dimension_numbers<[1], [0], [0], [1], [0, 0, 1, 1], [], []>} : vector<16x32xbf16>, vector<32x128xbf16>, vector<16x128xf32> -> vector<16x128xf32>
    %95 = arith.truncf %94 : vector<16x128xf32> to vector<16x128xbf16>
    %c0_67 = arith.constant 0 : index
    %c0_68 = arith.constant 0 : index
    %c0_69 = arith.constant 0 : index
    %96 = vector.load %arg14[%c0_67, %c0_68, %c0_69] : memref<3x128x128xbf16, #tpu.memory_space<vmem>>, vector<1x128x128xbf16>
    %97 = vector.shape_cast %96 : vector<1x128x128xbf16> to vector<128x128xbf16>
    %cst_70 = arith.constant dense<0.000000e+00> : vector<16x128xf32>
    %98 = tpu.matmul %95, %97, %cst_70 {dimension_numbers = #tpu.dot_dimension_numbers<[1], [0], [0], [1], [0, 0, 1, 1], [], []>} : vector<16x128xbf16>, vector<128x128xbf16>, vector<16x128xf32> -> vector<16x128xf32>
    %c1_71 = arith.constant 1 : index
    %c0_72 = arith.constant 0 : index
    %c0_73 = arith.constant 0 : index
    %99 = vector.load %arg13[%c1_71, %c0_72, %c0_73] : memref<3x16x32xbf16, #tpu.memory_space<vmem>>, vector<1x16x32xbf16>
    %100 = vector.shape_cast %99 : vector<1x16x32xbf16> to vector<16x32xbf16>
    %cst_74 = arith.constant dense<0.000000e+00> : vector<16x128xf32>
    %101 = tpu.matmul %100, %91, %cst_74 {dimension_numbers = #tpu.dot_dimension_numbers<[1], [0], [0], [1], [0, 0, 1, 1], [], []>} : vector<16x32xbf16>, vector<32x128xbf16>, vector<16x128xf32> -> vector<16x128xf32>
    %102 = arith.truncf %101 : vector<16x128xf32> to vector<16x128xbf16>
    %c1_75 = arith.constant 1 : index
    %c0_76 = arith.constant 0 : index
    %c0_77 = arith.constant 0 : index
    %103 = vector.load %arg14[%c1_75, %c0_76, %c0_77] : memref<3x128x128xbf16, #tpu.memory_space<vmem>>, vector<1x128x128xbf16>
    %104 = vector.shape_cast %103 : vector<1x128x128xbf16> to vector<128x128xbf16>
    %cst_78 = arith.constant dense<0.000000e+00> : vector<16x128xf32>
    %105 = tpu.matmul %102, %104, %cst_78 {dimension_numbers = #tpu.dot_dimension_numbers<[1], [0], [0], [1], [0, 0, 1, 1], [], []>} : vector<16x128xbf16>, vector<128x128xbf16>, vector<16x128xf32> -> vector<16x128xf32>
    %106 = arith.addf %98, %105 : vector<16x128xf32>
    %c2_79 = arith.constant 2 : index
    %c0_80 = arith.constant 0 : index
    %c0_81 = arith.constant 0 : index
    %107 = vector.load %arg13[%c2_79, %c0_80, %c0_81] : memref<3x16x32xbf16, #tpu.memory_space<vmem>>, vector<1x16x32xbf16>
    %108 = vector.shape_cast %107 : vector<1x16x32xbf16> to vector<16x32xbf16>
    %cst_82 = arith.constant dense<0.000000e+00> : vector<16x128xf32>
    %109 = tpu.matmul %108, %91, %cst_82 {dimension_numbers = #tpu.dot_dimension_numbers<[1], [0], [0], [1], [0, 0, 1, 1], [], []>} : vector<16x32xbf16>, vector<32x128xbf16>, vector<16x128xf32> -> vector<16x128xf32>
    %110 = arith.truncf %109 : vector<16x128xf32> to vector<16x128xbf16>
    %c2_83 = arith.constant 2 : index
    %c0_84 = arith.constant 0 : index
    %c0_85 = arith.constant 0 : index
    %111 = vector.load %arg14[%c2_83, %c0_84, %c0_85] : memref<3x128x128xbf16, #tpu.memory_space<vmem>>, vector<1x128x128xbf16>
    %112 = vector.shape_cast %111 : vector<1x128x128xbf16> to vector<128x128xbf16>
    %cst_86 = arith.constant dense<0.000000e+00> : vector<16x128xf32>
    %113 = tpu.matmul %110, %112, %cst_86 {dimension_numbers = #tpu.dot_dimension_numbers<[1], [0], [0], [1], [0, 0, 1, 1], [], []>} : vector<16x128xbf16>, vector<128x128xbf16>, vector<16x128xf32> -> vector<16x128xf32>
    %114 = arith.addf %106, %113 : vector<16x128xf32>
    %115 = vector.broadcast %64 : vector<1x128xf32> to vector<16x128xf32>
    %116 = arith.addf %114, %115 : vector<16x128xf32>
    %cst_87 = arith.constant 0.000000e+00 : f32
    %117 = vector.broadcast %cst_87 : f32 to vector<16x128xf32>
    %118 = arith.maximumf %116, %117 : vector<16x128xf32>
    %c0_88 = arith.constant 0 : index
    %c0_89 = arith.constant 0 : index
    %119 = vector.load %arg16[%c0_88, %c0_89] : memref<2x16xf32, #tpu.memory_space<vmem>>, vector<2x16xf32>
    %c0_90 = arith.constant 0 : index
    %c0_91 = arith.constant 0 : index
    %120 = vector.load %arg17[%c0_90, %c0_91] : memref<128x16xf32, #tpu.memory_space<vmem>>, vector<128x16xf32>
    %c0_92 = arith.constant 0 : index
    %c0_93 = arith.constant 0 : index
    %121 = vector.load %arg18[%c0_92, %c0_93] : memref<16x1xf32, #tpu.memory_space<vmem>>, vector<16x1xf32>
    %c0_94 = arith.constant 0 : index
    %c0_95 = arith.constant 0 : index
    %122 = vector.load %arg19[%c0_94, %c0_95] : memref<1x1xf32, #tpu.memory_space<vmem>>, vector<1x1xf32>
    %cst_96 = arith.constant dense<0.000000e+00> : vector<2x128xf32>
    %123 = tpu.matmul %119, %118, %cst_96 {dimension_numbers = #tpu.dot_dimension_numbers<[1], [0], [0], [1], [0, 0, 1, 1], [], []>} : vector<2x16xf32>, vector<16x128xf32>, vector<2x128xf32> -> vector<2x128xf32>
    %cst_97 = arith.constant dense<0.000000e+00> : vector<2x16xf32>
    %124 = tpu.matmul %123, %120, %cst_97 {dimension_numbers = #tpu.dot_dimension_numbers<[1], [0], [0], [1], [0, 0, 1, 1], [], []>} : vector<2x128xf32>, vector<128x16xf32>, vector<2x16xf32> -> vector<2x16xf32>
    %cst_98 = arith.constant dense<0.000000e+00> : vector<2x1xf32>
    %125 = tpu.matmul %124, %121, %cst_98 {dimension_numbers = #tpu.dot_dimension_numbers<[1], [0], [0], [1], [0, 0, 1, 1], [], []>} : vector<2x16xf32>, vector<16x1xf32>, vector<2x1xf32> -> vector<2x1xf32>
    %126 = vector.broadcast %122 : vector<1x1xf32> to vector<2x1xf32>
    %127 = arith.addf %125, %126 : vector<2x1xf32>
    %c0_99 = arith.constant 0 : index
    %c0_100 = arith.constant 0 : index
    %128 = vector.load %arg20[%c0_99, %c0_100] : memref<2x1xf32, #tpu.memory_space<vmem>>, vector<2x1xf32>
    tpu.vector_store %arg20[%c0_99, %c0_100], %127 {strides = array<i32>} : memref<2x1xf32, #tpu.memory_space<vmem>>, vector<2x1xf32>,
    return
  }
  func.func @transform_0(%arg0: i32) -> (i32, i32) {
    %c0_i32 = arith.constant 0 : i32
    %c0_i32_0 = arith.constant 0 : i32
    %c0_i32_1 = arith.constant 0 : i32
    return %c0_i32, %c0_i32_0 : i32, i32
  }
  func.func @transform_1(%arg0: i32) -> (i32, i32) {
    %c0_i32 = arith.constant 0 : i32
    %c0_i32_0 = arith.constant 0 : i32
    %c0_i32_1 = arith.constant 0 : i32
    return %c0_i32, %c0_i32_0 : i32, i32
  }
  func.func @transform_2(%arg0: i32) -> (i32, i32) {
    %c0_i32 = arith.constant 0 : i32
    %c0_i32_0 = arith.constant 0 : i32
    %c0_i32_1 = arith.constant 0 : i32
    return %c0_i32, %c0_i32_0 : i32, i32
  }
  func.func @transform_3(%arg0: i32) -> (i32, i32) {
    %c0_i32 = arith.constant 0 : i32
    %c0_i32_0 = arith.constant 0 : i32
    %c0_i32_1 = arith.constant 0 : i32
    return %c0_i32, %c0_i32_0 : i32, i32
  }
  func.func @transform_4(%arg0: i32) -> (i32, i32) {
    %c0_i32 = arith.constant 0 : i32
    %c0_i32_0 = arith.constant 0 : i32
    %c0_i32_1 = arith.constant 0 : i32
    return %c0_i32, %c0_i32_0 : i32, i32
  }
  func.func @transform_5(%arg0: i32) -> (i32, i32, i32) {
    %c0_i32 = arith.constant 0 : i32
    %c0_i32_0 = arith.constant 0 : i32
    %c0_i32_1 = arith.constant 0 : i32
    %c0_i32_2 = arith.constant 0 : i32
    return %c0_i32, %c0_i32_0, %c0_i32_1 : i32, i32, i32
  }
  func.func @transform_6(%arg0: i32) -> (i32, i32, i32) {
    %c0_i32 = arith.constant 0 : i32
    %c0_i32_0 = arith.constant 0 : i32
    %c0_i32_1 = arith.constant 0 : i32
    %c0_i32_2 = arith.constant 0 : i32
    return %c0_i32, %c0_i32_0, %c0_i32_1 : i32, i32, i32
  }
  func.func @transform_7(%arg0: i32) -> (i32, i32) {
    %c0_i32 = arith.constant 0 : i32
    %c0_i32_0 = arith.constant 0 : i32
    %c0_i32_1 = arith.constant 0 : i32
    return %c0_i32, %c0_i32_0 : i32, i32
  }
  func.func @transform_8(%arg0: i32) -> (i32, i32) {
    %c0_i32 = arith.constant 0 : i32
    %c0_i32_0 = arith.constant 0 : i32
    %c0_i32_1 = arith.constant 0 : i32
    return %c0_i32, %c0_i32_0 : i32, i32
  }
  func.func @transform_9(%arg0: i32) -> (i32, i32) {
    %c0_i32 = arith.constant 0 : i32
    %c0_i32_0 = arith.constant 0 : i32
    %c0_i32_1 = arith.constant 0 : i32
    return %c0_i32, %c0_i32_0 : i32, i32
  }
  func.func @transform_10(%arg0: i32) -> (i32, i32) {
    %c0_i32 = arith.constant 0 : i32
    %c0_i32_0 = arith.constant 0 : i32
    %c0_i32_1 = arith.constant 0 : i32
    return %c0_i32, %c0_i32_0 : i32, i32
  }
  func.func @transform_11(%arg0: i32) -> (i32, i32) {
    %c0_i32 = arith.constant 0 : i32
    %c0_i32_0 = arith.constant 0 : i32
    %c0_i32_1 = arith.constant 0 : i32
    return %c0_i32, %c0_i32_0 : i32, i32
  }
  func.func @transform_12(%arg0: i32) -> (i32, i32, i32) {
    %c0_i32 = arith.constant 0 : i32
    %c0_i32_0 = arith.constant 0 : i32
    %c0_i32_1 = arith.constant 0 : i32
    %c0_i32_2 = arith.constant 0 : i32
    return %c0_i32, %c0_i32_0, %c0_i32_1 : i32, i32, i32
  }
  func.func @transform_13(%arg0: i32) -> (i32, i32, i32) {
    %c0_i32 = arith.constant 0 : i32
    %c0_i32_0 = arith.constant 0 : i32
    %c0_i32_1 = arith.constant 0 : i32
    %c0_i32_2 = arith.constant 0 : i32
    return %c0_i32, %c0_i32_0, %c0_i32_1 : i32, i32, i32
  }
  func.func @transform_14(%arg0: i32) -> (i32, i32) {
    %c0_i32 = arith.constant 0 : i32
    %c0_i32_0 = arith.constant 0 : i32
    %c0_i32_1 = arith.constant 0 : i32
    return %c0_i32, %c0_i32_0 : i32, i32
  }
  func.func @transform_15(%arg0: i32) -> (i32, i32) {
    %c0_i32 = arith.constant 0 : i32
    %c0_i32_0 = arith.constant 0 : i32
    %c0_i32_1 = arith.constant 0 : i32
    return %c0_i32, %c0_i32_0 : i32, i32
  }
  func.func @transform_16(%arg0: i32) -> (i32, i32) {
    %c0_i32 = arith.constant 0 : i32
    %c0_i32_0 = arith.constant 0 : i32
    %c0_i32_1 = arith.constant 0 : i32
    return %c0_i32, %c0_i32_0 : i32, i32
  }
  func.func @transform_17(%arg0: i32) -> (i32, i32) {
    %c0_i32 = arith.constant 0 : i32
    %c0_i32_0 = arith.constant 0 : i32
    %c0_i32_1 = arith.constant 0 : i32
    return %c0_i32, %c0_i32_0 : i32, i32
  }
  func.func @transform_18(%arg0: i32) -> (i32, i32) {
    %c0_i32 = arith.constant 0 : i32
    %c0_i32_0 = arith.constant 0 : i32
    %c0_i32_1 = arith.constant 0 : i32
    return %c0_i32, %c0_i32_0 : i32, i32
  }
  func.func @transform_19(%arg0: i32) -> (i32, i32) {
    %c0_i32 = arith.constant 0 : i32
    %c0_i32_0 = arith.constant 0 : i32
    %c0_i32_1 = arith.constant 0 : i32
    return %c0_i32, %c0_i32_0 : i32, i32
  }
}

</mosaic_0001>

<bundles_post_ra>
// kernel: tpu_custom_call.1
= control target key start
LH: loop header
LB: loop body
LE: loop exit
PB: predicated region body
PF: predicated region fallthrough
CT: control target
= control target key end

     0   :  { %s3912_s0 = inlined_call_operand.vmem [shape: f32[32,64], index: 0, kind: input, shape index: {}]   ;;  %s3913_s1 = inlined_call_operand.hbm [shape: f32[1,4], index: 1, kind: input, shape index: {}]   ;;  %s3914_s2 = inlined_call_operand.hbm [shape: f32[1,4], index: 2, kind: input, shape index: {}]   ;;  %s3915_s3 = inlined_call_operand.vmem [shape: f32[64,4], index: 3, kind: input, shape index: {}]   ;;  %s3916_s4 = inlined_call_operand.hbm [shape: f32[4,64], index: 4, kind: input, shape index: {}]   ;;  %s3917_s5 = inlined_call_operand.vmem [shape: bf16[3,32,32], index: 5, kind: input, shape index: {}]   ;;  %s3918_s6 = inlined_call_operand.vmem [shape: bf16[3,64,128], index: 6, kind: input, shape index: {}]   ;;  %s3919_s7 = inlined_call_operand.hbm [shape: f32[1,128], index: 7, kind: input, shape index: {}]   ;;  %s3920_s8 = inlined_call_operand.hbm [shape: f32[1,8], index: 8, kind: input, shape index: {}]   ;;  %s3921_s9 = inlined_call_operand.hbm [shape: f32[1,8], index: 9, kind: input, shape index: {}]   ;;  %s3922_s10 = inlined_call_operand.vmem [shape: f32[128,8], index: 10, kind: input, shape index: {}]   ;;  %s3923_s11 = inlined_call_operand.hbm [shape: f32[8,128], index: 11, kind: input, shape index: {}]   ;;  %s3924_s12 = inlined_call_operand.vmem [shape: bf16[3,16,32], index: 12, kind: input, shape index: {}]   ;;  %s3925_s13 = inlined_call_operand.vmem [shape: bf16[3,128,128], index: 13, kind: input, shape index: {}]   ;;  %s3926_s14 = inlined_call_operand.vmem [shape: f32[1,128], index: 14, kind: input, shape index: {}]   ;;  %s3927_s15 = inlined_call_operand.vmem [shape: f32[2,16], index: 15, kind: input, shape index: {}]   ;;  %s3928_s16 = inlined_call_operand.vmem [shape: f32[128,16], index: 16, kind: input, shape index: {}]   ;;  %s3929_s17 = inlined_call_operand.vmem [shape: f32[16,1], index: 17, kind: input, shape index: {}]   ;;  %s3930_s18 = inlined_call_operand.<no memory space> [shape: f32[1,1], index: 18, kind: input, shape index: {}]   ;;  %s3931_s19 = inlined_call_operand.vmem [shape: f32[2,1], index: 19, kind: output, shape index: {}]  }
   0x1   :  { %3936 = sst [smem:[#allocation18_spill]] %s3912_s0  ;;  %v24_v0 = vstv %s3930_s18 }
   0x2   :  { %3937 = sst [smem:[#allocation19_spill]] %s3913_s1  ;;  %25 = vst [vmem:[#allocation2] sm:$0x1] %v24_v0 }
   0x3   :  { %3938 = sst [smem:[#allocation20_spill]] %s3914_s2 }
   0x4   :  { %3939 = sst [smem:[#allocation21_spill]] %s3915_s3 }
   0x5   :  { %26 = vsyncpa [#allocation4], 0 }
   0x6   :  { %27 = vsyncpa [#allocation6], 0 }
   0x7   :  { %28 = vsyncpa [#allocation9], 0 }
   0x8   :  { %29 = vsyncpa [#allocation12], 0  ;;  %s3220_s20 = smov [#allocation5]   ;;  %s3221_s1 = smov [#allocation8]  }
   0x9   :  { %s48_s21 = sshll.u32 %s3220_s20, 4  ;;  %s74_s22 = sshll.u32 %s3221_s1, 4  ;;  %s49_s21 = int_to_ptr.vmem [resolvable:$true] %s48_s21  ;;  %s75_s22 = int_to_ptr.vmem [resolvable:$true] %s74_s22 }
   0xa   :  { %s3940_s24 = sld [smem:[#allocation20_spill]] }
  0x10   :  { %s3058_s25 = scalar_lea.hbm %s3940_s24, 16 }
  0x11   :  { %p3059_p0 = scmp.ne.s32.totalorder %s3940_s24, %s3058_s25  ;;  %p3062_p1 = scmp.lt.u32.totalorder %s3058_s25, %s3940_s24 }
  0x13   :  { %p3064_p2 = pnand %p3062_p1, %p3059_p0 }
  0x15   :  { %3067 = shalt.err (!%p3064_p2)
}
  0x16   :  { %s3068_s28 = scalar_lea.vmem %s49_s21, 16  ;;  %s3072_s29 = scalar_lea.vmem %s49_s21, 32 }
  0x17   :  { %p3069_p3 = scmp.ne.s32.totalorder %s49_s21, %s3068_s28  ;;  %p3073_p4 = scmp.lt.s32.totalorder %s49_s21, %s49_s21 }
  0x18   :  { %p3074_p5 = scmp.lt.s32.totalorder %s3072_s29, %s3068_s28 }
  0x1a   :  { %p3075_p6 = por %p3074_p5, %p3073_p4 }
  0x1c   :  { %p3076_p7 = pnand %p3075_p6, %p3069_p3 }
  0x1e   :  { %3079 = shalt.err (!%p3076_p7)
}
  0x1f   :  { %51 = dma.hbm_to_vmem [thread:$0]  %s3940_s24, 16, %s49_s21, [#allocation6]  }
  0x20   :  { %s3080_s2 = scalar_lea.hbm %s3919_s7, 16 }
  0x21   :  { %p3081_p8 = scmp.ne.s32.totalorder %s3919_s7, %s3080_s2  ;;  %p3084_p9 = scmp.lt.u32.totalorder %s3080_s2, %s3919_s7 }
  0x23   :  { %p3086_p10 = pnand %p3084_p9, %p3081_p8 }
  0x25   :  { %3089 = shalt.err (!%p3086_p10)
}
  0x26   :  { %s3090_s18 = scalar_lea.vmem %s75_s22, 16  ;;  %s3094_s27 = scalar_lea.vmem %s75_s22, 32 }
  0x27   :  { %p3091_p11 = scmp.ne.s32.totalorder %s75_s22, %s3090_s18  ;;  %p3095_p12 = scmp.lt.s32.totalorder %s75_s22, %s75_s22 }
  0x28   :  { %p3096_p13 = scmp.lt.s32.totalorder %s3094_s27, %s3090_s18 }
  0x2a   :  { %p3097_p0 = por %p3096_p13, %p3095_p12 }
  0x2c   :  { %p3098_p1 = pnand %p3097_p0, %p3091_p11 }
  0x2e   :  { %3101 = shalt.err (!%p3098_p1)
}
  0x2f   :  { %77 = dma.hbm_to_vmem [thread:$0]  %s3919_s7, 16, %s75_s22, [#allocation9]  }
  0x30   :  { %s3222_s28 = smov [#allocation11]   ;;  %s3223_s0 = smov [#allocation3]  }
  0x31   :  { %s94_s29 = sshll.u32 %s3222_s28, 4  ;;  %s38_s30 = sshll.u32 %s3223_s0, 4  ;;  %s95_s29 = int_to_ptr.vmem [resolvable:$true] %s94_s29  ;;  %s39_s30 = int_to_ptr.vmem [resolvable:$true] %s38_s30 }
  0x32   :  { %s3102_s2 = scalar_lea.hbm %s3921_s9, 16 }
  0x33   :  { %p3103_p2 = scmp.ne.s32.totalorder %s3921_s9, %s3102_s2  ;;  %p3106_p3 = scmp.lt.u32.totalorder %s3102_s2, %s3921_s9 }
  0x35   :  { %p3108_p4 = pnand %p3106_p3, %p3103_p2 }
  0x37   :  { %3111 = shalt.err (!%p3108_p4)
}
  0x38   :  { %s3112_s7 = scalar_lea.vmem %s95_s29, 16  ;;  %s3116_s22 = scalar_lea.vmem %s95_s29, 32 }
  0x39   :  { %p3113_p5 = scmp.ne.s32.totalorder %s95_s29, %s3112_s7  ;;  %p3117_p6 = scmp.lt.s32.totalorder %s95_s29, %s95_s29 }
  0x3a   :  { %p3118_p7 = scmp.lt.s32.totalorder %s3116_s22, %s3112_s7 }
  0x3c   :  { %p3119_p8 = por %p3118_p7, %p3117_p6 }
  0x3e   :  { %p3120_p9 = pnand %p3119_p8, %p3113_p5 }
  0x40   :  { %3123 = shalt.err (!%p3120_p9)
}
  0x41   :  { %97 = dma.hbm_to_vmem [thread:$0]  %s3921_s9, 16, %s95_s29, [#allocation12]  }
  0x42   :  { %s3941_s28 = sld [smem:[#allocation19_spill]] }
  0x48   :  { %s3124_s0 = scalar_lea.hbm %s3941_s28, 16 }
  0x49   :  { %p3125_p10 = scmp.ne.s32.totalorder %s3941_s28, %s3124_s0  ;;  %p3128_p11 = scmp.lt.u32.totalorder %s3124_s0, %s3941_s28 }
  0x4b   :  { %p3130_p12 = pnand %p3128_p11, %p3125_p10 }
  0x4d   :  { %3133 = shalt.err (!%p3130_p12)
}
  0x4e   :  { %s3134_s25 = scalar_lea.vmem %s39_s30, 16  ;;  %s3138_s3 = scalar_lea.vmem %s39_s30, 32 }
  0x4f   :  { %p3135_p13 = scmp.ne.s32.totalorder %s39_s30, %s3134_s25  ;;  %p3139_p0 = scmp.lt.s32.totalorder %s39_s30, %s39_s30 }
  0x50   :  { %p3140_p1 = scmp.lt.s32.totalorder %s3138_s3, %s3134_s25 }
  0x52   :  { %p3141_p2 = por %p3140_p1, %p3139_p0 }
  0x54   :  { %p3142_p3 = pnand %p3141_p2, %p3135_p13 }
  0x56   :  { %3145 = shalt.err (!%p3142_p3)
}
  0x57   :  { %41 = dma.hbm_to_vmem [thread:$0]  %s3941_s28, 16, %s39_s30, [#allocation4]  }
  0x58   :  { %s3224_s26 = smov [#allocation7]   ;;  %s3225_s22 = smov [#allocation10]  }
  0x59   :  { %s60_s7 = sshll.u32 %s3224_s26, 4  ;;  %s84_s18 = sshll.u32 %s3225_s22, 4  ;;  %s61_s7 = int_to_ptr.vmem [resolvable:$true] %s60_s7  ;;  %s85_s18 = int_to_ptr.vmem [resolvable:$true] %s84_s18 }
  0x5a   :  { %s3146_s24 = scalar_lea.hbm %s3916_s4, 64 }
  0x5b   :  { %p3147_p4 = scmp.ne.s32.totalorder %s3916_s4, %s3146_s24  ;;  %p3150_p5 = scmp.lt.u32.totalorder %s3146_s24, %s3916_s4 }
  0x5d   :  { %p3152_p6 = pnand %p3150_p5, %p3147_p4 }
  0x5f   :  { %3155 = shalt.err (!%p3152_p6)
}
  0x60   :  { %s3156_s30 = scalar_lea.vmem %s61_s7, 64  ;;  %p3161_p8 = scmp.lt.s32.totalorder %s61_s7, %s61_s7 }
  0x61   :  { %p3157_p7 = scmp.ne.s32.totalorder %s61_s7, %s3156_s30  ;;  %p3162_p9 = scmp.lt.s32.totalorder %s3156_s30, %s3156_s30 }
  0x63   :  { %p3163_p10 = por %p3162_p9, %p3161_p8 }
  0x65   :  { %p3164_p11 = pnand %p3163_p10, %p3157_p7 }
  0x67   :  { %3167 = shalt.err (!%p3164_p11)
}
  0x68   :  { %63 = dma.hbm_to_vmem [thread:$0]  %s3916_s4, 64, %s61_s7, [#allocation6]  }
  0x69   :  { %s3168_s9 = scalar_lea.hbm %s3920_s8, 16 }
  0x6a   :  { %p3169_p12 = scmp.ne.s32.totalorder %s3920_s8, %s3168_s9  ;;  %p3172_p13 = scmp.lt.u32.totalorder %s3168_s9, %s3920_s8 }
  0x6c   :  { %p3174_p0 = pnand %p3172_p13, %p3169_p12 }
  0x6e   :  { %3177 = shalt.err (!%p3174_p0)
}
  0x6f   :  { %s3178_s21 = scalar_lea.vmem %s85_s18, 16  ;;  %s3182_s24 = scalar_lea.vmem %s85_s18, 32 }
  0x70   :  { %p3179_p1 = scmp.ne.s32.totalorder %s85_s18, %s3178_s21  ;;  %p3183_p2 = scmp.lt.s32.totalorder %s85_s18, %s85_s18 }
  0x71   :  { %p3184_p3 = scmp.lt.s32.totalorder %s3182_s24, %s3178_s21 }
  0x73   :  { %p3185_p4 = por %p3184_p3, %p3183_p2 }
  0x75   :  { %p3186_p5 = pnand %p3185_p4, %p3179_p1 }
  0x77   :  { %3189 = shalt.err (!%p3186_p5)
}
  0x78   :  { %87 = dma.hbm_to_vmem [thread:$0]  %s3920_s8, 16, %s85_s18, [#allocation9]  }
  0x79   :  { %s3226_s0 = smov [#allocation13]   ;;  %s3190_s30 = scalar_lea.hbm %s3923_s11, 128 }
  0x7a   :  { %s106_s20 = sshll.u32 %s3226_s0, 4  ;;  %p3191_p6 = scmp.ne.s32.totalorder %s3923_s11, %s3190_s30  ;;  %s107_s20 = int_to_ptr.vmem [resolvable:$true] %s106_s20 }
  0x7b   :  { %p3194_p7 = scmp.lt.u32.totalorder %s3190_s30, %s3923_s11 }
  0x7d   :  { %p3196_p8 = pnand %p3194_p7, %p3191_p6 }
  0x7f   :  { %3199 = shalt.err (!%p3196_p8)
}
  0x80   :  { %s3200_s9 = scalar_lea.vmem %s107_s20, 128  ;;  %p3205_p10 = scmp.lt.s32.totalorder %s107_s20, %s107_s20 }
  0x81   :  { %p3201_p9 = scmp.ne.s32.totalorder %s107_s20, %s3200_s9  ;;  %p3206_p11 = scmp.lt.s32.totalorder %s3200_s9, %s3200_s9 }
  0x83   :  { %p3207_p12 = por %p3206_p11, %p3205_p10 }
  0x85   :  { %p3208_p13 = pnand %p3207_p12, %p3201_p9 }
  0x87   :  { %3211 = shalt.err (!%p3208_p13)
}
  0x88   :  { %109 = dma.hbm_to_vmem [thread:$0]  %s3923_s11, 128, %s107_s20, [#allocation12]  }
  0x89   :  { %3212 = dma.done.wait [#allocation4], 16  }
  0x8a   :  { %3213 = vsyncadd [#allocation4], 4294967280 }
  0x8b   :  { %3214 = dma.done.wait [#allocation6], 80  }
  0x8c   :  { %3215 = vsyncadd [#allocation6], 4294967216 }
  0x8d   :  { %3216 = dma.done.wait [#allocation9], 32  }
  0x8e   :  { %3217 = vsyncadd [#allocation9], 4294967264 }
  0x8f   :  { %3218 = dma.done.wait [#allocation12], 144  }
  0x90   :  { %3219 = vsyncadd [#allocation12], 4294967152  ;;  %v3227_v1 = vmov 0.0|0.0   ;;  %vm3228_vm0 = vmmov 0   ;;  %v3229_v2 = vmov 0.0   ;;  %s3942_s26 = sld [smem:[#allocation21_spill]]  ;;  %v329_v36 = vlaneseq }
  0x91   :  { %2889 = vmatprep.subr.bf16.mxu0 %v3227_v1  ;;  %2574 = vmatprep.mubr.msk.f32.mxu0 %vm3228_vm0, %v3229_v2  ;;  %vm162_vm1 = vcmask 523264   ;;  %s3943_s30 = sld [smem:[#allocation18_spill]]  ;;  %v160_v32 = vld [vmem:[#allocation7] sm:$0xf]  ;;  %vm255_vm2 = vcmask 1043456   ;;  %vm251_vm3 = vcmask 31744  }
  0x92   :  { %2577 = vmatprep.subr.mxu1 %v3229_v2  ;;  %2579 = vmatprep.mubr.msk.f32.mxu1 %vm3228_vm0, %v3229_v2  ;;  %v330_v37 = vshrl.u32 %v329_v36, 7  ;;  %vm611_vm4 = vcmask 261120   ;;  %v3018_v36 = vld [vmem:[%s3918_s6 + $0x38] sm:$0xff]   ;;  %vm1194_vm5 = vcmask 64512   ;;  %vm2036_vm6 = vcmask 130048  }
  0x93   :  { %2578 = vmatpush3.msk.msra.mxu1 %vm255_vm2, %v160_v32  ;;  %vm2259_vm7 = vcmask 1024  }
  0x94   :  { %2901 = vmatprep.subr.bf16.mxu1 %v3227_v1  ;;  %v3488_v38 = vsub.s32 0, %v330_v37  ;;  %v3019_v37 = vld [vmem:[%s3918_s6] sm:$0xff]  }
  0x96   :  { %v152_v3 = vld [vmem:[%s3942_s26] sm:$0xff]  ;;  %v153_v4 = vld [vmem:[%s3942_s26 + $0x8] sm:$0xff]  ;;  %v154_v5 = vld [vmem:[%s3942_s26 + $0x10] sm:$0xff] }
  0x97   :  { %v2890_v6 = vpack.c.bf16 %v153_v4, %v152_v3  ;;  %v155_v7 = vld [vmem:[%s3942_s26 + $0x18] sm:$0xff]  ;;  %v156_v8 = vld [vmem:[%s3942_s26 + $0x20] sm:$0xff]  ;;  %v3446_v11 = vld [vmem:[%s3943_s30 + $0x8] sm:$0xff] }
  0x98   :  { %v3441_v9 = vld [vmem:[%s3943_s30] sm:$0xff]  ;;  %v2893_v10 = vpack.c.bf16 %v155_v7, %v154_v5  ;;  %v3451_v12 = vld [vmem:[%s3943_s30 + $0x10] sm:$0xff]  ;;  %v3456_v13 = vld [vmem:[%s3943_s30 + $0x18] sm:$0xff]  ;;  %v164_v16 = vsel %vm162_vm1, %v3446_v11, 0.0 }
  0x99   :  { %2891 = vmatpush3.bf16.msra.mxu0 %v2890_v6  ;;  %v163_v14 = vsel %vm162_vm1, %v3441_v9, 0.0  ;;  %v157_v15 = vld [vmem:[%s3942_s26 + $0x28] sm:$0xff]  ;;  %v166_v17 = vsel %vm162_vm1, %v3451_v12, 0.0  ;;  %v168_v18 = vsel %vm162_vm1, %v3456_v13, 0.0  ;;  %v158_v20 = vld [vmem:[%s3942_s26 + $0x30] sm:$0xff]  ;;  %v159_v21 = vld [vmem:[%s3942_s26 + $0x38] sm:$0xff] }
  0x9a   :  { %2892 = vmatprep.subr.bf16.mxu0 %v3227_v1  ;;  %v165_v19 = vadd.f32 %v164_v16, %v163_v14  ;;  %v2896_v22 = vpack.c.bf16 %v157_v15, %v156_v8  ;;  %v2899_v25 = vpack.c.bf16 %v159_v21, %v158_v20  ;;  %v150_v5 = vld [vmem:[#allocation3] sm:$0x1]  ;;  %v151_v8 = vld [vmem:[#allocation5] sm:$0x1]  ;;  %v3009_v15 = vld [vmem:[%s3917_s5 + $0x10] sm:$0xff]  }
  0x9b   :  { %v3011_v16 = vld [vmem:[%s3917_s5] sm:$0xff]  }
  0x9c   :  { %v167_v23 = vadd.f32 %v166_v17, %v165_v19 }
  0x9d   :  { %2894 = vmatpush3.bf16.msra.mxu0 %v2893_v10 }
  0x9e   :  { %2895 = vmatprep.subr.bf16.mxu0 %v3227_v1  ;;  %v169_v24 = vadd.f32 %v168_v18, %v167_v23 }
  0xa0   :  { %v170_v26 = vrot.slane %v169_v24, 4 }
  0xa1   :  { %2897 = vmatpush3.bf16.msra.mxu0 %v2896_v22 }
  0xa2   :  { %2898 = vmatprep.subr.bf16.mxu0 %v3227_v1  ;;  %v171_v27 = vadd.f32 %v170_v26, %v169_v24 }
  0xa4   :  { %v172_v28 = vrot.slane %v171_v27, 2 }
  0xa5   :  { %2900 = vmatpush3.bf16.msra.mxu0 %v2899_v25 }
  0xa6   :  { %v173_v29 = vadd.f32 %v172_v28, %v171_v27 }
  0xa8   :  { %v174_v30 = vrot.slane %v173_v29, 1 }
  0xaa   :  { %v175_v31 = vadd.f32 %v174_v30, %v173_v29 }
  0xac   :  { %2575 = vmatmul.mubr.msk.f32.vlgmr.msra.gmra.mrb[0].mxu0 %vm162_vm1, %v175_v31 }
  0xad   :  { %2615 = vmatprep.mubr.msk.bf16.mxu0 %vm611_vm4, %v3011_v16  ;;  %v1103_v16 = vld [vmem:[%s3922_s10 + $0x38] sm:$0xff] }
 0x17f   :  { %v245_v33 = vpop.f32.mrb[0].mxu0 }
 0x180   :  { %v250_v34 = vmul.f32 0.001953125, %v245_v33  ;;  %v2576_v35 = vpop.f32.mrb[1].mxu0  ;;  %v3016_v33 = vld [vmem:[%s3918_s6 + $0x28] sm:$0xff]  }
 0x181   :  { %v3014_v35 = vld [vmem:[%s3917_s5 + $0x28] sm:$0xff]  }
 0x182   :  { %2580 = vmatmul.mubr.msk.f32.vlgmr.msra.gmra.mrb[0].mxu1 %vm251_vm3, %v250_v34 }
 0x183   :  { %2903 = vmatpush3.bf16.msra.mxu1 %v2890_v6  ;;  %2598 = vmatprep.mubr.msk.f32.mxu1 %vm3228_vm0, %v3229_v2 }
 0x184   :  { %2904 = vmatprep.subr.bf16.mxu1 %v3227_v1 }
 0x187   :  { %2906 = vmatpush3.bf16.msra.mxu1 %v2893_v10 }
 0x188   :  { %2907 = vmatprep.subr.bf16.mxu1 %v3227_v1 }
 0x18b   :  { %2909 = vmatpush3.bf16.msra.mxu1 %v2896_v22 }
 0x18c   :  { %2910 = vmatprep.subr.bf16.mxu1 %v3227_v1 }
 0x18f   :  { %2912 = vmatpush3.bf16.msra.mxu1 %v2899_v25 }
 0x190   :  { %2601 = vmatprep.subr.mxu1 %v3229_v2 }
 0x255   :  { %v325_v39 = vpop.f32.mrb[0].mxu1 }
 0x256   :  { %v332_v40 = vrot.slane %v325_v39, %v3488_v38  ;;  %v2581_v41 = vpop.f32.mrb[1].mxu1  ;;  %v1096_v39 = vld [vmem:[%s3922_s10] sm:$0xff] }
 0x257   :  { %v1098_v41 = vld [vmem:[%s3922_s10 + $0x10] sm:$0xff] }
 0x258   :  { %v333_v42 = vsub.f32 %v3441_v9, %v332_v40  ;;  %v334_v43 = vsub.f32 %v3446_v11, %v332_v40  ;;  %v335_v44 = vsub.f32 %v3451_v12, %v332_v40  ;;  %v336_v45 = vsub.f32 %v3456_v13, %v332_v40  ;;  %v1097_v40 = vld [vmem:[%s3922_s10 + $0x8] sm:$0xff] }
 0x25a   :  { %v337_v46 = vmul.f32 %v333_v42, %v333_v42  ;;  %v338_v47 = vmul.f32 %v334_v43, %v334_v43  ;;  %v339_v48 = vmul.f32 %v335_v44, %v335_v44  ;;  %v340_v49 = vmul.f32 %v336_v45, %v336_v45  ;;  %v1099_v43 = vld [vmem:[%s3922_s10 + $0x18] sm:$0xff] }
 0x25b   :  { %v3566_v42 = vpack.c.bf16 %v1097_v40, %v1096_v39  ;;  %v3572_v44 = vpack.c.bf16 %v1099_v43, %v1098_v41 }
 0x25c   :  { %v341_v50 = vsel %vm162_vm1, %v337_v46, 0.0  ;;  %v342_v51 = vsel %vm162_vm1, %v338_v47, 0.0  ;;  %v344_v53 = vsel %vm162_vm1, %v339_v48, 0.0  ;;  %v346_v55 = vsel %vm162_vm1, %v340_v49, 0.0 }
 0x25d   :  { %v343_v52 = vadd.f32 %v342_v51, %v341_v50 }
 0x25f   :  { %v345_v54 = vadd.f32 %v344_v53, %v343_v52 }
 0x261   :  { %v347_v56 = vadd.f32 %v346_v55, %v345_v54 }
 0x263   :  { %v348_v57 = vrot.slane %v347_v56, 4 }
 0x265   :  { %v349_v58 = vadd.f32 %v348_v57, %v347_v56  ;;  %v3020_v57 = vld [vmem:[%s3918_s6 + $0x8] sm:$0xff]  }
 0x267   :  { %v350_v59 = vrot.slane %v349_v58, 2 }
 0x269   :  { %v351_v60 = vadd.f32 %v350_v59, %v349_v58  ;;  %v3021_v59 = vld [vmem:[%s3918_s6 + $0x10] sm:$0xff]  }
 0x26b   :  { %v352_v61 = vrot.slane %v351_v60, 1 }
 0x26d   :  { %v353_v62 = vadd.f32 %v352_v61, %v351_v60 }
 0x26f   :  { %2599 = vmatmul.mubr.msk.f32.vlgmr.msra.gmra.mrb[2].mxu1 %vm162_vm1, %v353_v62 }
 0x270   :  { %2602 = vmatpush3.msk.msra.mxu1 %vm255_vm2, %v160_v32  ;;  %2603 = vmatprep.mubr.msk.f32.mxu1 %vm3228_vm0, %v3229_v2 }
 0x271   :  { %2606 = vmatprep.subr.mxu1 %v3229_v2 }
 0x342   :  { %v423_v63 = vpop.f32.mrb[2].mxu1 }
 0x343   :  { %v427_v0 = vmul.f32 0.001953125, %v423_v63  ;;  %v2600_v3 = vpop.f32.mrb[3].mxu1 }
 0x344   :  { %v3022_v3 = vld [vmem:[%s3918_s6 + $0x18] sm:$0xff]  }
 0x345   :  { %v428_v4 = vadd.f32 1e-05, %v427_v0 }
 0x347   :  { %3054 = vrsqrt.f32 %v428_v4  ;;  %v3023_v4 = vld [vmem:[%s3918_s6 + $0x40] sm:$0xff]  }
 0x351   :  { %v3055_v6 = vpop.eup %3054 }
 0x352   :  { %v430_v7 = vmul.f32 %v3055_v6, %v150_v5  ;;  %v3024_v5 = vld [vmem:[%s3918_s6 + $0x48] sm:$0xff]   ;;  %v3025_v6 = vld [vmem:[%s3918_s6 + $0x50] sm:$0xff]  }
 0x354   :  { %2604 = vmatmul.mubr.msk.f32.vlgmr.msra.gmra.mrb[4].mxu1 %vm251_vm3, %v430_v7  ;;  %v431_v10 = vmul.f32 %v430_v7, %v250_v34  ;;  %v3017_v34 = vld [vmem:[%s3918_s6 + $0x30] sm:$0xff]   ;;  %v3026_v7 = vld [vmem:[%s3918_s6 + $0x58] sm:$0xff]  }
 0x355   :  { %2607 = vmatpush3.msk.msra.mxu1 %vm255_vm2, %v160_v32  ;;  %2608 = vmatprep.mubr.msk.f32.mxu1 %vm3228_vm0, %v3229_v2 }
 0x356   :  { %v432_v14 = vsub.f32 %v151_v8, %v431_v10  ;;  %v1100_v8 = vld [vmem:[%s3922_s10 + $0x20] sm:$0xff]  ;;  %v1101_v10 = vld [vmem:[%s3922_s10 + $0x28] sm:$0xff] }
 0x358   :  { %2609 = vmatmul.mubr.msk.f32.vlgmr.msra.gmra.mrb[6].mxu1 %vm251_vm3, %v432_v14  ;;  %v3613_v14 = vpack.c.bf16 %v1101_v10, %v1100_v8 }
 0x359   :  { %2623 = vmatprep.mubr.msk.bf16.mxu1 %vm611_vm4, %v3009_v15  ;;  %v1102_v15 = vld [vmem:[%s3922_s10 + $0x30] sm:$0xff] }
 0x427   :  { %v502_v17 = vpop.f32.mrb[4].mxu1 }
 0x428   :  { %v582_v18 = vrot.slane %v502_v17, %v3488_v38  ;;  %v2605_v19 = vpop.f32.mrb[5].mxu1  ;;  %v3623_v17 = vpack.c.bf16 %v1103_v16, %v1102_v15 }
 0x429   :  { %v1105_v19 = vld [vmem:[%s3922_s10 + $0x48] sm:$0xff] }
 0x42a   :  { %v583_v20 = vmul.f32 %v582_v18, %v3441_v9  ;;  %v584_v22 = vmul.f32 %v582_v18, %v3446_v11  ;;  %v585_v23 = vmul.f32 %v582_v18, %v3451_v12  ;;  %v586_v24 = vmul.f32 %v582_v18, %v3456_v13  ;;  %v3015_v9 = vld [vmem:[%s3918_s6 + $0x20] sm:$0xff]   ;;  %v3010_v11 = vld [vmem:[%s3917_s5 + $0x18] sm:$0xff]   ;;  %v3012_v12 = vld [vmem:[%s3917_s5 + $0x8] sm:$0xff]  }
 0x42b   :  { %v575_v21 = vpop.f32.mrb[6].mxu1  ;;  %v3013_v13 = vld [vmem:[%s3917_s5 + $0x20] sm:$0xff]  }
 0x42c   :  { %v590_v25 = vrot.slane %v575_v21, %v3488_v38  ;;  %v2610_v26 = vpop.f32.mrb[7].mxu1  ;;  %v1104_v18 = vld [vmem:[%s3922_s10 + $0x40] sm:$0xff]  ;;  %v1106_v21 = vld [vmem:[%s3922_s10 + $0x50] sm:$0xff] }
 0x42e   :  { %v591_v27 = vadd.f32 %v590_v25, %v583_v20  ;;  %v592_v28 = vadd.f32 %v590_v25, %v584_v22  ;;  %v593_v29 = vadd.f32 %v590_v25, %v585_v23  ;;  %v594_v30 = vadd.f32 %v590_v25, %v586_v24  ;;  %v1107_v22 = vld [vmem:[%s3922_s10 + $0x58] sm:$0xff]  ;;  %v1108_v24 = vld [vmem:[%s3922_s10 + $0x60] sm:$0xff]  ;;  %v1109_v25 = vld [vmem:[%s3922_s10 + $0x68] sm:$0xff] }
 0x42f   :  { %v2926_v20 = vpack.c.bf16 %v1105_v19, %v1104_v18  ;;  %v2929_v23 = vpack.c.bf16 %v1107_v22, %v1106_v21  ;;  %v2932_v26 = vpack.c.bf16 %v1109_v25, %v1108_v24  ;;  %v1094_v19 = vld [vmem:[#allocation10] sm:$0x1]  ;;  %v1095_v22 = vld [vmem:[#allocation11] sm:$0x1]  ;;  %v3029_v25 = vld [vmem:[%s3925_s13] sm:$0xff]  }
 0x430   :  { %v595_v31 = vpack.c.bf16 %v592_v28, %v591_v27  ;;  %v596_v32 = vpack.c.bf16 %v594_v30, %v593_v29  ;;  %v1110_v27 = vld [vmem:[%s3922_s10 + $0x70] sm:$0xff]  ;;  %v1111_v28 = vld [vmem:[%s3922_s10 + $0x78] sm:$0xff]  ;;  %v2331_v30 = vld [vmem:[#allocation8] ss:$0 sm:$0xff] }
 0x431   :  { %v2935_v29 = vpack.c.bf16 %v1111_v28, %v1110_v27  ;;  %v3032_v27 = vld [vmem:[%s3925_s13 + $0x10] sm:$0xff]   ;;  %v3034_v28 = vld [vmem:[%s3925_s13 + $0x18] sm:$0xff]  }
 0x432   :  { %2611 = vmatprep.subr.bf16.mxu0 %v595_v31  ;;  %2619 = vmatprep.subr.bf16.mxu1 %v595_v31 }
 0x433   :  { %2612 = vmatpush3.bf16.msra.mxu0 %v595_v31  ;;  %2620 = vmatpush3.bf16.msra.mxu1 %v595_v31 }
 0x434   :  { %2613 = vmatprep.subr.bf16.mxu0 %v596_v32  ;;  %2621 = vmatprep.subr.bf16.mxu1 %v596_v32 }
 0x437   :  { %2614 = vmatpush3.bf16.msra.mxu0 %v596_v32  ;;  %2622 = vmatpush3.bf16.msra.mxu1 %v596_v32 }
 0x438   :  { %2651 = vmatprep.subr.bf16.mxu1 %v595_v31  ;;  %2627 = vmatprep.subr.bf16.mxu0 %v3015_v9 }
 0x43a   :  { %2624 = vmatmul.mubr.msk.bf16.vlgmr.msra.gmra.mrb[8].mxu1 %vm611_vm4, %v3010_v11  ;;  %2616 = vmatmul.mubr.msk.bf16.vlgmr.msra.gmra.mrb[4].mxu0 %vm611_vm4, %v3012_v12 }
 0x43b   :  { %2652 = vmatpush3.bf16.msra.mxu1 %v595_v31  ;;  %2655 = vmatprep.mubr.msk.bf16.mxu1 %vm611_vm4, %v3013_v13 }
 0x43c   :  { %2653 = vmatprep.subr.bf16.mxu1 %v596_v32  ;;  %2628 = vmatpush3.bf16.msra.mxu0 %v3015_v9 }
 0x43d   :  { %2629 = vmatprep.subr.bf16.mxu0 %v3016_v33 }
 0x43f   :  { %2654 = vmatpush3.bf16.msra.mxu1 %v596_v32 }
 0x440   :  { %2630 = vmatpush3.bf16.msra.mxu0 %v3016_v33  ;;  %2913 = vmatprep.subr.bf16.mxu1 %v3227_v1 }
 0x441   :  { %2631 = vmatprep.subr.bf16.mxu0 %v3017_v34 }
 0x442   :  { %2656 = vmatmul.mubr.msk.bf16.vlgmr.msra.gmra.mrb[12].mxu1 %vm611_vm4, %v3014_v35 }
 0x443   :  { %2703 = vmatprep.mubr.msk.f32.mxu1 %vm3228_vm0, %v3229_v2  ;;  %2915 = vmatpush3.bf16.msra.mxu1 %v3566_v42 }
 0x444   :  { %2632 = vmatpush3.bf16.msra.mxu0 %v3017_v34  ;;  %2916 = vmatprep.subr.bf16.mxu1 %v3227_v1 }
 0x445   :  { %2633 = vmatprep.subr.bf16.mxu0 %v3018_v36 }
 0x447   :  { %2918 = vmatpush3.bf16.msra.mxu1 %v3572_v44 }
 0x448   :  { %2634 = vmatpush3.bf16.msra.mxu0 %v3018_v36  ;;  %2919 = vmatprep.subr.bf16.mxu1 %v3227_v1 }
 0x449   :  { %2639 = vmatprep.subr.bf16.mxu0 %v3019_v37 }
 0x44b   :  { %2921 = vmatpush3.bf16.msra.mxu1 %v3613_v14 }
 0x44c   :  { %2922 = vmatprep.subr.bf16.mxu1 %v3227_v1 }
 0x44f   :  { %2924 = vmatpush3.bf16.msra.mxu1 %v3623_v17 }
 0x450   :  { %2925 = vmatprep.subr.bf16.mxu1 %v3227_v1 }
 0x453   :  { %2927 = vmatpush3.bf16.msra.mxu1 %v2926_v20 }
 0x454   :  { %2928 = vmatprep.subr.bf16.mxu1 %v3227_v1 }
 0x457   :  { %2930 = vmatpush3.bf16.msra.mxu1 %v2929_v23 }
 0x458   :  { %2931 = vmatprep.subr.bf16.mxu1 %v3227_v1 }
 0x45b   :  { %2933 = vmatpush3.bf16.msra.mxu1 %v2932_v26 }
 0x45c   :  { %2934 = vmatprep.subr.bf16.mxu1 %v3227_v1 }
 0x45f   :  { %2936 = vmatpush3.bf16.msra.mxu1 %v2935_v29 }
 0x460   :  { %2706 = vmatprep.subr.mxu1 %v3229_v2 }
 0x50d   :  { %v2625_v45 = vpop.f32.mrb[8].mxu1  ;;  %v2617_v46 = vpop.f32.mrb[4].mxu0 }
 0x50e   :  { %v732_v47 = vpop.f32.mrb[9].mxu1  ;;  %v652_v48 = vpop.f32.mrb[5].mxu0 }
 0x50f   :  { %v2626_v49 = vpop.f32.mrb[10].mxu1  ;;  %v2618_v50 = vpop.f32.mrb[6].mxu0 }
 0x510   :  { %v748_v51 = vpack.c.bf16 %v2626_v49, %v2625_v45  ;;  %v735_v52 = vpop.f32.mrb[11].mxu1  ;;  %v668_v53 = vpack.c.bf16 %v2618_v50, %v2617_v46  ;;  %v655_v54 = vpop.f32.mrb[7].mxu0 }
 0x511   :  { %v747_v55 = vpack.c.bf16 %v735_v52, %v732_v47  ;;  %v667_v56 = vpack.c.bf16 %v655_v54, %v652_v48 }
 0x513   :  { %2635 = vmatprep.mubr.msk.bf16.mxu0 %vm162_vm1, %v747_v55 }
 0x514   :  { %2636 = vmatmul.mubr.msk.bf16.vlgmr.msra.gmra.mrb[8].mxu0 %vm162_vm1, %v748_v51  ;;  %v1112_v51 = vld [vmem:[#allocation13] sm:$0xff] }
 0x515   :  { %2640 = vmatpush3.bf16.msra.mxu0 %v3019_v37  ;;  %2647 = vmatprep.mubr.msk.bf16.mxu0 %vm162_vm1, %v667_v56  ;;  %v2657_v58 = vpop.f32.mrb[12].mxu1 }
 0x516   :  { %2641 = vmatprep.subr.bf16.mxu0 %v3020_v57  ;;  %v971_v60 = vpop.f32.mrb[13].mxu1 }
 0x517   :  { %v2658_v61 = vpop.f32.mrb[14].mxu1 }
 0x518   :  { %v987_v62 = vpack.c.bf16 %v2658_v61, %v2657_v58  ;;  %v974_v63 = vpop.f32.mrb[15].mxu1 }
 0x519   :  { %2642 = vmatpush3.bf16.msra.mxu0 %v3020_v57  ;;  %v986_v0 = vpack.c.bf16 %v974_v63, %v971_v60 }
 0x51a   :  { %2643 = vmatprep.subr.bf16.mxu0 %v3021_v59 }
 0x51d   :  { %2644 = vmatpush3.bf16.msra.mxu0 %v3021_v59 }
 0x51e   :  { %2645 = vmatprep.subr.bf16.mxu0 %v3022_v3 }
 0x521   :  { %2646 = vmatpush3.bf16.msra.mxu0 %v3022_v3 }
 0x522   :  { %2659 = vmatprep.subr.bf16.mxu0 %v3023_v4 }
 0x524   :  { %2648 = vmatmul.mubr.msk.bf16.vlgmr.msra.gmra.mrb[8].mxu0 %vm162_vm1, %v668_v53 }
 0x525   :  { %2660 = vmatpush3.bf16.msra.mxu0 %v3023_v4  ;;  %2667 = vmatprep.mubr.msk.bf16.mxu0 %vm162_vm1, %v986_v0 }
 0x526   :  { %2661 = vmatprep.subr.bf16.mxu0 %v3024_v5 }
 0x529   :  { %2662 = vmatpush3.bf16.msra.mxu0 %v3024_v5 }
 0x52a   :  { %2663 = vmatprep.subr.bf16.mxu0 %v3025_v6 }
 0x52d   :  { %2664 = vmatpush3.bf16.msra.mxu0 %v3025_v6 }
 0x52e   :  { %2665 = vmatprep.subr.bf16.mxu0 %v3026_v7 }
 0x531   :  { %2666 = vmatpush3.bf16.msra.mxu0 %v3026_v7 }
 0x532   :  { %2746 = vmatprep.subr.mxu0 %v3229_v2 }
 0x534   :  { %2668 = vmatmul.mubr.msk.bf16.vlgmr.msra.gmra.mrb[8].mxu0 %vm162_vm1, %v987_v62 }
 0x535   :  { %2748 = vmatprep.mubr.msk.f32.mxu0 %vm3228_vm0, %v3229_v2  ;;  %2747 = vmatpush3.msra.mxu0 %v1112_v51 }
 0x536   :  { %2751 = vmatprep.subr.mxu0 %v3229_v2 }
 0x607   :  { %v2669_v31 = vpop.f32.mrb[8].mxu0 }
 0x608   :  { %v1061_v32 = vpop.f32.mrb[9].mxu0  ;;  %v1088_v13 = vadd.f32 %v2669_v31, %v2331_v30  ;;  %v3040_v31 = vld [vmem:[%s3925_s13 + $0x30] sm:$0xff]  }
 0x609   :  { %v1086_v9 = vadd.f32 %v2331_v30, %v1061_v32  ;;  %v2670_v11 = vpop.f32.mrb[10].mxu0 }
 0x60a   :  { %v1064_v12 = vpop.f32.mrb[11].mxu0  ;;  %v1089_v35 = vadd.f32 %v2670_v11, %v2331_v30  ;;  %v3659_v37 = vmax.f32 %v1088_v13, 0.0 }
 0x60b   :  { %v1087_v33 = vadd.f32 %v2331_v30, %v1064_v12  ;;  %v3655_v34 = vmax.f32 %v1086_v9, 0.0  ;;  %v3038_v30 = vld [vmem:[%s3925_s13 + $0x28] sm:$0xff]  }
 0x60c   :  { %v3663_v40 = vmax.f32 %v1089_v35, 0.0 }
 0x60d   :  { %v3657_v36 = vmax.f32 %v1087_v33, 0.0 }
 0x60f   :  { %v1114_v39 = vadd.f32 %v3657_v36, %v3655_v34 }
 0x611   :  { %v1115_v41 = vadd.f32 %v1114_v39, %v3659_v37 }
 0x613   :  { %v1116_v43 = vadd.f32 %v1115_v41, %v3663_v40 }
 0x615   :  { %v1117_v45 = vrot.slane %v1116_v43, 4 }
 0x617   :  { %v1118_v46 = vadd.f32 %v1117_v45, %v1116_v43 }
 0x619   :  { %v1119_v47 = vrot.slane %v1118_v46, 2 }
 0x61b   :  { %v1120_v48 = vadd.f32 %v1119_v47, %v1118_v46 }
 0x61d   :  { %v1121_v49 = vrot.slane %v1120_v48, 1 }
 0x61f   :  { %v1122_v50 = vadd.f32 %v1121_v49, %v1120_v48 }
 0x621   :  { %2704 = vmatmul.mubr.f32.vlgmr.msra.gmra.mrb[16].mxu1 %v1122_v50 }
 0x622   :  { %2708 = vmatprep.mubr.msk.f32.mxu1 %vm3228_vm0, %v3229_v2  ;;  %2707 = vmatpush3.msra.mxu1 %v1112_v51 }
 0x623   :  { %2937 = vmatprep.subr.bf16.mxu1 %v3227_v1 }
 0x6f4   :  { %v1189_v52 = vpop.f32.mrb[16].mxu1 }
 0x6f5   :  { %v1193_v53 = vmul.f32 0.001953125, %v1189_v52  ;;  %v2705_v54 = vpop.f32.mrb[17].mxu1  ;;  %v3039_v52 = vld [vmem:[%s3925_s13 + $0x60] sm:$0xff]  }
 0x6f6   :  { %v3042_v54 = vld [vmem:[%s3925_s13 + $0x38] sm:$0xff]  }
 0x6f7   :  { %2709 = vmatmul.mubr.msk.f32.vlgmr.msra.gmra.mrb[18].mxu1 %vm1194_vm5, %v1193_v53 }
 0x6f8   :  { %2939 = vmatpush3.bf16.msra.mxu1 %v3566_v42  ;;  %2743 = vmatprep.mubr.msk.f32.mxu1 %vm3228_vm0, %v3229_v2 }
 0x6f9   :  { %2940 = vmatprep.subr.bf16.mxu1 %v3227_v1 }
 0x6fc   :  { %2942 = vmatpush3.bf16.msra.mxu1 %v3572_v44 }
 0x6fd   :  { %2943 = vmatprep.subr.bf16.mxu1 %v3227_v1 }
 0x700   :  { %2945 = vmatpush3.bf16.msra.mxu1 %v3613_v14 }
 0x701   :  { %2946 = vmatprep.subr.bf16.mxu1 %v3227_v1 }
 0x704   :  { %2948 = vmatpush3.bf16.msra.mxu1 %v3623_v17 }
 0x705   :  { %2949 = vmatprep.subr.bf16.mxu1 %v3227_v1 }
 0x708   :  { %2951 = vmatpush3.bf16.msra.mxu1 %v2926_v20 }
 0x709   :  { %2952 = vmatprep.subr.bf16.mxu1 %v3227_v1 }
 0x70c   :  { %2954 = vmatpush3.bf16.msra.mxu1 %v2929_v23 }
 0x70d   :  { %2955 = vmatprep.subr.bf16.mxu1 %v3227_v1 }
 0x710   :  { %2957 = vmatpush3.bf16.msra.mxu1 %v2932_v26  ;;  %v3030_v26 = vld [vmem:[%s3925_s13 + $0x8] sm:$0xff]  }
 0x711   :  { %2958 = vmatprep.subr.bf16.mxu1 %v3227_v1 }
 0x714   :  { %2960 = vmatpush3.bf16.msra.mxu1 %v2935_v29  ;;  %v3036_v29 = vld [vmem:[%s3925_s13 + $0x20] sm:$0xff]  }
 0x715   :  { %2792 = vmatprep.subr.bf16.mxu1 %v3229_v2 }
 0x7ca   :  { %v1264_v42 = vpop.f32.mrb[18].mxu1 }
 0x7cb   :  { %v1271_v44 = vrot.slane %v1264_v42, %v3488_v38  ;;  %v2710_v55 = vpop.f32.mrb[19].mxu1  ;;  %v3043_v42 = vld [vmem:[%s3925_s13 + $0x70] sm:$0xff]  }
 0x7cd   :  { %v1272_v56 = vsub.f32 %v3655_v34, %v1271_v44  ;;  %v1273_v57 = vsub.f32 %v3657_v36, %v1271_v44  ;;  %v1274_v58 = vsub.f32 %v3659_v37, %v1271_v44  ;;  %v1275_v59 = vsub.f32 %v3663_v40, %v1271_v44  ;;  %v3044_v44 = vld [vmem:[%s3925_s13 + $0x78] sm:$0xff]  }
 0x7cf   :  { %v1276_v60 = vmul.f32 %v1272_v56, %v1272_v56  ;;  %v1277_v61 = vmul.f32 %v1273_v57, %v1273_v57  ;;  %v1278_v62 = vmul.f32 %v1274_v58, %v1274_v58  ;;  %v1279_v0 = vmul.f32 %v1275_v59, %v1275_v59  ;;  %v3046_v58 = vld [vmem:[%s3925_s13 + $0x80] sm:$0xff]  }
 0x7d1   :  { %v1280_v63 = vadd.f32 %v1277_v61, %v1276_v60  ;;  %v3047_v61 = vld [vmem:[%s3925_s13 + $0x88] sm:$0xff]  }
 0x7d3   :  { %v1281_v3 = vadd.f32 %v1280_v63, %v1278_v62 }
 0x7d5   :  { %v1282_v4 = vadd.f32 %v1281_v3, %v1279_v0 }
 0x7d7   :  { %v1283_v5 = vrot.slane %v1282_v4, 4 }
 0x7d9   :  { %v1284_v6 = vadd.f32 %v1283_v5, %v1282_v4  ;;  %v3048_v5 = vld [vmem:[%s3925_s13 + $0x90] sm:$0xff]  }
 0x7db   :  { %v1285_v7 = vrot.slane %v1284_v6, 2 }
 0x7dd   :  { %v1286_v8 = vadd.f32 %v1285_v7, %v1284_v6  ;;  %v3045_v6 = vld [vmem:[%s3924_s12 + $0x10] sm:$0xff]   ;;  %v3049_v7 = vld [vmem:[%s3925_s13 + $0x98] sm:$0xff]  }
 0x7df   :  { %v1287_v10 = vrot.slane %v1286_v8, 1 }
 0x7e1   :  { %v1288_v14 = vadd.f32 %v1287_v10, %v1286_v8  ;;  %v3050_v8 = vld [vmem:[%s3925_s13 + $0xa0] sm:$0xff]   ;;  %v3051_v10 = vld [vmem:[%s3925_s13 + $0xa8] sm:$0xff]  }
 0x7e3   :  { %2744 = vmatmul.mubr.f32.vlgmr.msra.gmra.mrb[20].mxu1 %v1288_v14  ;;  %v3052_v14 = vld [vmem:[%s3925_s13 + $0xb0] sm:$0xff]  }
 0x7e4   :  { %2808 = vmatprep.mubr.msk.bf16.mxu1 %vm3228_vm0, %v3229_v2  ;;  %2793 = vmatpush3.bf16.msra.mxu1 %v3029_v25 }
 0x7e5   :  { %2794 = vmatprep.subr.bf16.mxu1 %v3229_v2 }
 0x7e8   :  { %2795 = vmatpush3.bf16.msra.mxu1 %v3030_v26 }
 0x7e9   :  { %2796 = vmatprep.subr.bf16.mxu1 %v3229_v2 }
 0x7ec   :  { %2797 = vmatpush3.bf16.msra.mxu1 %v3032_v27 }
 0x7ed   :  { %2798 = vmatprep.subr.bf16.mxu1 %v3229_v2 }
 0x7f0   :  { %2799 = vmatpush3.bf16.msra.mxu1 %v3034_v28 }
 0x7f1   :  { %2800 = vmatprep.subr.bf16.mxu1 %v3229_v2 }
 0x7f4   :  { %2801 = vmatpush3.bf16.msra.mxu1 %v3036_v29 }
 0x7f5   :  { %2802 = vmatprep.subr.bf16.mxu1 %v3229_v2 }
 0x7f8   :  { %2803 = vmatpush3.bf16.msra.mxu1 %v3038_v30 }
 0x7f9   :  { %2804 = vmatprep.subr.bf16.mxu1 %v3229_v2 }
 0x7fc   :  { %2805 = vmatpush3.bf16.msra.mxu1 %v3040_v31  ;;  %v2401_v31 = vld [vmem:[%s3926_s14] ss:$0 sm:$0xff] }
 0x7fd   :  { %2806 = vmatprep.subr.bf16.mxu1 %v3229_v2 }
 0x800   :  { %2807 = vmatpush3.bf16.msra.mxu1 %v3042_v54  ;;  %v2026_v54 = vld [vmem:[%s3928_s16 + $0x48] sm:$0xff] }
 0x801   :  { %2820 = vmatprep.subr.bf16.mxu1 %v3229_v2 }
 0x8b6   :  { %v1355_v15 = vpop.f32.mrb[20].mxu1 }
 0x8b7   :  { %v1359_v16 = vmul.f32 0.001953125, %v1355_v15  ;;  %v2745_v17 = vpop.f32.mrb[21].mxu1  ;;  %v3053_v15 = vld [vmem:[%s3925_s13 + $0xb8] sm:$0xff]  }
 0x8b9   :  { %v1360_v18 = vadd.f32 1e-05, %v1359_v16 }
 0x8bb   :  { %3056 = vrsqrt.f32 %v1360_v18 }
 0x8c5   :  { %v3057_v20 = vpop.eup %3056 }
 0x8c6   :  { %v1362_v21 = vmul.f32 %v3057_v20, %v1094_v19 }
 0x8c8   :  { %2749 = vmatmul.mubr.msk.f32.vlgmr.msra.gmra.mrb[2].mxu0 %vm1194_vm5, %v1362_v21  ;;  %v1363_v23 = vmul.f32 %v1362_v21, %v1193_v53  ;;  %v3041_v53 = vld [vmem:[%s3925_s13 + $0x68] sm:$0xff]  }
 0x8c9   :  { %2752 = vmatpush3.msra.mxu0 %v1112_v51  ;;  %2753 = vmatprep.mubr.msk.f32.mxu0 %vm3228_vm0, %v3229_v2  ;;  %v3037_v51 = vld [vmem:[%s3925_s13 + $0x58] sm:$0xff]  }
 0x8ca   :  { %v1364_v24 = vsub.f32 %v1095_v22, %v1363_v23  ;;  %2756 = vmatprep.subr.bf16.mxu0 %v3229_v2 }
 0x8cc   :  { %2754 = vmatmul.mubr.msk.f32.vlgmr.msra.gmra.mrb[12].mxu0 %vm1194_vm5, %v1364_v24 }
 0x8cd   :  { %2760 = vmatprep.mubr.msk.bf16.mxu0 %vm3228_vm0, %v3229_v2 }
 0x99b   :  { %v1434_v32 = vpop.f32.mrb[2].mxu0 }
 0x99c   :  { %v1514_v9 = vrot.slane %v1434_v32, %v3488_v38  ;;  %v2750_v11 = vpop.f32.mrb[3].mxu0 }
 0x99e   :  { %v1515_v12 = vmul.f32 %v1514_v9, %v3655_v34  ;;  %v1516_v33 = vmul.f32 %v1514_v9, %v3657_v36  ;;  %v1517_v35 = vmul.f32 %v1514_v9, %v3659_v37  ;;  %v1518_v39 = vmul.f32 %v1514_v9, %v3663_v40  ;;  %v3027_v34 = vld [vmem:[%s3924_s12] sm:$0xff]   ;;  %v3033_v37 = vld [vmem:[%s3925_s13 + $0x48] sm:$0xff]   ;;  %v3035_v40 = vld [vmem:[%s3925_s13 + $0x50] sm:$0xff]  }
 0x99f   :  { %v1507_v13 = vpop.f32.mrb[12].mxu0  ;;  %v3031_v36 = vld [vmem:[%s3925_s13 + $0x40] sm:$0xff]  }
 0x9a0   :  { %v1522_v41 = vrot.slane %v1507_v13, %v3488_v38  ;;  %v2755_v43 = vpop.f32.mrb[13].mxu0  ;;  %v3028_v38 = vld [vmem:[%s3924_s12 + $0x8] sm:$0xff]  }
 0x9a2   :  { %v1523_v45 = vadd.f32 %v1522_v41, %v1515_v12  ;;  %v1524_v46 = vadd.f32 %v1522_v41, %v1516_v33  ;;  %v1525_v47 = vadd.f32 %v1522_v41, %v1517_v35  ;;  %v1526_v48 = vadd.f32 %v1522_v41, %v1518_v39 }
 0x9a4   :  { %v1527_v49 = vpack.c.bf16 %v1524_v46, %v1523_v45  ;;  %v3734_v50 = vpack.c.bf16 %v1526_v48, %v1525_v47  ;;  %v2017_v45 = vld [vmem:[%s3928_s16] sm:$0xff]  ;;  %v2018_v46 = vld [vmem:[%s3928_s16 + $0x8] sm:$0xff] }
 0x9a5   :  { %v2016_v48 = vld [vmem:[%s3927_s15] sm:$0x3] }
 0x9a6   :  { %2757 = vmatpush3.bf16.msra.mxu0 %v1527_v49 }
 0x9a7   :  { %2758 = vmatprep.subr.bf16.mxu0 %v3229_v2 }
 0x9aa   :  { %2759 = vmatpush3.bf16.msra.mxu0 %v3734_v50 }
 0x9ab   :  { %2764 = vmatprep.subr.bf16.mxu0 %v3229_v2 }
 0x9ad   :  { %2761 = vmatmul.mubr.msk.bf16.vlgmr.msra.gmra.mrb[16].mxu0 %vm611_vm4, %v3027_v34  ;;  %v2020_v34 = vld [vmem:[%s3928_s16 + $0x18] sm:$0xff] }
 0x9ae   :  { %2765 = vmatpush3.bf16.msra.mxu0 %v1527_v49  ;;  %2768 = vmatprep.mubr.msk.bf16.mxu0 %vm3228_vm0, %v3229_v2 }
 0x9af   :  { %2766 = vmatprep.subr.bf16.mxu0 %v3229_v2 }
 0x9b2   :  { %2767 = vmatpush3.bf16.msra.mxu0 %v3734_v50 }
 0x9b3   :  { %2772 = vmatprep.subr.bf16.mxu0 %v3229_v2 }
 0x9b5   :  { %2769 = vmatmul.mubr.msk.bf16.vlgmr.msra.gmra.mrb[20].mxu0 %vm611_vm4, %v3028_v38 }
 0x9b6   :  { %2773 = vmatpush3.bf16.msra.mxu0 %v3031_v36  ;;  %2788 = vmatprep.mubr.msk.bf16.mxu0 %vm3228_vm0, %v3229_v2  ;;  %v2021_v36 = vld [vmem:[%s3928_s16 + $0x20] sm:$0xff] }
 0x9b7   :  { %2774 = vmatprep.subr.bf16.mxu0 %v3229_v2 }
 0x9ba   :  { %2775 = vmatpush3.bf16.msra.mxu0 %v3033_v37  ;;  %v2022_v37 = vld [vmem:[%s3928_s16 + $0x28] sm:$0xff] }
 0x9bb   :  { %2776 = vmatprep.subr.bf16.mxu0 %v3229_v2 }
 0x9be   :  { %2777 = vmatpush3.bf16.msra.mxu0 %v3035_v40  ;;  %v2971_v40 = vpack.c.bf16 %v2022_v37, %v2021_v36 }
 0x9bf   :  { %2778 = vmatprep.subr.bf16.mxu0 %v3229_v2 }
 0x9c2   :  { %2779 = vmatpush3.bf16.msra.mxu0 %v3037_v51  ;;  %v2023_v51 = vld [vmem:[%s3928_s16 + $0x30] sm:$0xff] }
 0x9c3   :  { %2780 = vmatprep.subr.bf16.mxu0 %v3229_v2 }
 0x9c6   :  { %2781 = vmatpush3.bf16.msra.mxu0 %v3039_v52 }
 0x9c7   :  { %2782 = vmatprep.subr.bf16.mxu0 %v3229_v2 }
 0x9ca   :  { %2783 = vmatpush3.bf16.msra.mxu0 %v3041_v53  ;;  %v2025_v53 = vld [vmem:[%s3928_s16 + $0x40] sm:$0xff] }
 0x9cb   :  { %2784 = vmatprep.subr.bf16.mxu0 %v3229_v2 }
 0x9ce   :  { %2785 = vmatpush3.bf16.msra.mxu0 %v3043_v42  ;;  %v2977_v42 = vpack.c.bf16 %v2026_v54, %v2025_v53 }
 0x9cf   :  { %2786 = vmatprep.subr.bf16.mxu0 %v3229_v2 }
 0x9d2   :  { %2787 = vmatpush3.bf16.msra.mxu0 %v3044_v44  ;;  %v2027_v44 = vld [vmem:[%s3928_s16 + $0x50] sm:$0xff] }
 0x9d3   :  { %2812 = vmatprep.subr.bf16.mxu0 %v3229_v2 }
 0xa80   :  { %v1573_v55 = vpop.f32.mrb[16].mxu0 }
 0xa81   :  { %v2762_v56 = vpop.f32.mrb[17].mxu0 }
 0xa82   :  { %v1576_v57 = vpop.f32.mrb[18].mxu0 }
 0xa83   :  { %v1580_v59 = vpack.c.bf16 %v1576_v57, %v1573_v55  ;;  %v2763_v60 = vpop.f32.mrb[19].mxu0  ;;  %v2028_v55 = vld [vmem:[%s3928_s16 + $0x58] sm:$0xff]  ;;  %v2029_v57 = vld [vmem:[%s3928_s16 + $0x60] sm:$0xff] }
 0xa84   :  { %v2980_v56 = vpack.c.bf16 %v2028_v55, %v2027_v44  ;;  %v2031_v60 = vld [vmem:[%s3928_s16 + $0x70] sm:$0xff] }
 0xa85   :  { %2809 = vmatmul.mubr.bf16.vlgmr.msra.gmra.mrb[24].mxu1 %v1580_v59 }
 0xa86   :  { %2821 = vmatpush3.bf16.msra.mxu1 %v3046_v58  ;;  %2836 = vmatprep.mubr.msk.bf16.mxu1 %vm3228_vm0, %v3229_v2  ;;  %v2030_v58 = vld [vmem:[%s3928_s16 + $0x68] sm:$0xff] }
 0xa87   :  { %2822 = vmatprep.subr.bf16.mxu1 %v3229_v2  ;;  %v2983_v59 = vpack.c.bf16 %v2030_v58, %v2029_v57 }
 0xa88   :  { %v1642_v62 = vpop.f32.mrb[20].mxu0 }
 0xa89   :  { %v2770_v63 = vpop.f32.mrb[21].mxu0 }
 0xa8a   :  { %v1645_v0 = vpop.f32.mrb[22].mxu0  ;;  %2823 = vmatpush3.bf16.msra.mxu1 %v3047_v61  ;;  %v2032_v61 = vld [vmem:[%s3928_s16 + $0x78] sm:$0xff]  ;;  %v2033_v63 = vld [vmem:[%s3929_s17] sm:$0xff] }
 0xa8b   :  { %v1649_v3 = vpack.c.bf16 %v1645_v0, %v1642_v62  ;;  %v2771_v4 = vpop.f32.mrb[23].mxu0  ;;  %2824 = vmatprep.subr.bf16.mxu1 %v3229_v2  ;;  %v2986_v62 = vpack.c.bf16 %v2032_v61, %v2031_v60  ;;  %v2034_v0 = vld [vmem:[%s3929_s17 + $0x8] sm:$0xff] }
 0xa8d   :  { %2789 = vmatmul.mubr.bf16.vlgmr.msra.gmra.mrb[24].mxu0 %v1649_v3  ;;  %v2989_v3 = vpack.c.bf16 %v2034_v0, %v2033_v63 }
 0xa8e   :  { %2813 = vmatpush3.bf16.msra.mxu0 %v1527_v49  ;;  %2816 = vmatprep.mubr.msk.bf16.mxu0 %vm3228_vm0, %v3229_v2  ;;  %v2965_v49 = vpack.c.bf16 %v2018_v46, %v2017_v45 }
 0xa8f   :  { %2814 = vmatprep.subr.bf16.mxu0 %v3229_v2  ;;  %2825 = vmatpush3.bf16.msra.mxu1 %v3048_v5 }
 0xa90   :  { %2826 = vmatprep.subr.bf16.mxu1 %v3229_v2 }
 0xa92   :  { %2815 = vmatpush3.bf16.msra.mxu0 %v3734_v50  ;;  %v2019_v50 = vld [vmem:[%s3928_s16 + $0x10] sm:$0xff] }
 0xa93   :  { %2961 = vmatprep.subr.bf16.mxu0 %v3227_v1  ;;  %2827 = vmatpush3.bf16.msra.mxu1 %v3049_v7  ;;  %v2968_v38 = vpack.c.bf16 %v2020_v34, %v2019_v50 }
 0xa94   :  { %2828 = vmatprep.subr.bf16.mxu1 %v3229_v2 }
 0xa95   :  { %2817 = vmatmul.mubr.msk.bf16.vlgmr.msra.gmra.mrb[28].mxu0 %vm611_vm4, %v3045_v6 }
 0xa96   :  { %2844 = vmatprep.mubr.msk.f32.mxu0 %vm3228_vm0, %v3229_v2 }
 0xa97   :  { %2829 = vmatpush3.bf16.msra.mxu1 %v3050_v8  ;;  %v2403_v8 = vld [vmem:[#allocation2] ss:$0 sm:$0xff] }
 0xa98   :  { %2830 = vmatprep.subr.bf16.mxu1 %v3229_v2 }
 0xa9b   :  { %2831 = vmatpush3.bf16.msra.mxu1 %v3051_v10 }
 0xa9c   :  { %2832 = vmatprep.subr.bf16.mxu1 %v3229_v2 }
 0xa9f   :  { %2833 = vmatpush3.bf16.msra.mxu1 %v3052_v14 }
 0xaa0   :  { %2834 = vmatprep.subr.bf16.mxu1 %v3229_v2 }
 0xaa3   :  { %2835 = vmatpush3.bf16.msra.mxu1 %v3053_v15 }
 0xaa4   :  { %2988 = vmatprep.subr.bf16.mxu1 %v3227_v1 }
 0xb58   :  { %v1838_v16 = vpop.f32.mrb[24].mxu1 }
 0xb59   :  { %v2810_v17 = vpop.f32.mrb[25].mxu1 }
 0xb5a   :  { %v1841_v18 = vpop.f32.mrb[26].mxu1 }
 0xb5b   :  { %v2811_v19 = vpop.f32.mrb[27].mxu1 }
 0xb60   :  { %v1749_v20 = vpop.f32.mrb[24].mxu0 }
 0xb61   :  { %v1839_v21 = vadd.f32 %v1838_v16, %v1749_v20  ;;  %v2790_v22 = vpop.f32.mrb[25].mxu0 }
 0xb62   :  { %v1752_v23 = vpop.f32.mrb[26].mxu0 }
 0xb63   :  { %v1842_v24 = vadd.f32 %v1841_v18, %v1752_v23  ;;  %v2791_v25 = vpop.f32.mrb[27].mxu0 }
 0xb68   :  { %v1890_v26 = vpop.f32.mrb[28].mxu0 }
 0xb69   :  { %v2818_v27 = vpop.f32.mrb[29].mxu0 }
 0xb6a   :  { %v1893_v28 = vpop.f32.mrb[30].mxu0 }
 0xb6b   :  { %v1897_v29 = vpack.c.bf16 %v1893_v28, %v1890_v26  ;;  %v2819_v30 = vpop.f32.mrb[31].mxu0 }
 0xb6d   :  { %2837 = vmatmul.mubr.bf16.vlgmr.msra.gmra.mrb[28].mxu1 %v1897_v29 }
 0xb6e   :  { %2886 = vmatprep.mubr.msk.f32.mxu1 %vm3228_vm0, %v3229_v2  ;;  %2990 = vmatpush3.bf16.msra.mxu1 %v2989_v3 }
 0xc40   :  { %v1997_v32 = vpop.f32.mrb[28].mxu1 }
 0xc41   :  { %v2004_v9 = vadd.f32 %v1997_v32, %v1839_v21  ;;  %v2838_v11 = vpop.f32.mrb[29].mxu1 }
 0xc42   :  { %v2000_v12 = vpop.f32.mrb[30].mxu1 }
 0xc43   :  { %v2012_v13 = vadd.f32 %v2401_v31, %v2004_v9  ;;  %v2005_v33 = vadd.f32 %v2000_v12, %v1842_v24  ;;  %v2839_v35 = vpop.f32.mrb[31].mxu1 }
 0xc45   :  { %v2013_v39 = vadd.f32 %v2401_v31, %v2005_v33  ;;  %v2014_v41 = vmax.f32 %v2012_v13, 0.0 }
 0xc47   :  { %v2015_v43 = vmax.f32 %v2013_v39, 0.0 }
 0xc49   :  { %v2962_v47 = vpack.c.bf16 %v2015_v43, %v2014_v41 }
 0xc4b   :  { %2963 = vmatpush3.bf16.msra.mxu0 %v2962_v47 }
 0xc4c   :  { %2964 = vmatprep.subr.bf16.mxu0 %v3227_v1 }
 0xc4e   :  { %2845 = vmatmul.mubr.msk.f32.vlgmr.msra.gmra.mrb[14].mxu0 %vm2036_vm6, %v2016_v48 }
 0xc4f   :  { %2966 = vmatpush3.bf16.msra.mxu0 %v2965_v49  ;;  %2879 = vmatprep.mubr.msk.f32.mxu0 %vm3228_vm0, %v3229_v2  ;;  %v2024_v2 = vld [vmem:[%s3928_s16 + $0x38] sm:$0xff] }
 0xc50   :  { %2967 = vmatprep.subr.bf16.mxu0 %v3227_v1  ;;  %v2974_v52 = vpack.c.bf16 %v2024_v2, %v2023_v51 }
 0xc53   :  { %2969 = vmatpush3.bf16.msra.mxu0 %v2968_v38 }
 0xc54   :  { %2970 = vmatprep.subr.bf16.mxu0 %v3227_v1 }
 0xc57   :  { %2972 = vmatpush3.bf16.msra.mxu0 %v2971_v40 }
 0xc58   :  { %2973 = vmatprep.subr.bf16.mxu0 %v3227_v1 }
 0xc5b   :  { %2975 = vmatpush3.bf16.msra.mxu0 %v2974_v52 }
 0xc5c   :  { %2976 = vmatprep.subr.bf16.mxu0 %v3227_v1 }
 0xc5f   :  { %2978 = vmatpush3.bf16.msra.mxu0 %v2977_v42 }
 0xc60   :  { %2979 = vmatprep.subr.bf16.mxu0 %v3227_v1 }
 0xc63   :  { %2981 = vmatpush3.bf16.msra.mxu0 %v2980_v56 }
 0xc64   :  { %2982 = vmatprep.subr.bf16.mxu0 %v3227_v1 }
 0xc67   :  { %2984 = vmatpush3.bf16.msra.mxu0 %v2983_v59 }
 0xc68   :  { %2985 = vmatprep.subr.bf16.mxu0 %v3227_v1 }
 0xc6b   :  { %2987 = vmatpush3.bf16.msra.mxu0 %v2986_v62 }
 0xd21   :  { %v2106_v4 = vpop.f32.mrb[14].mxu0 }
 0xd22   :  { %v2846_v5 = vpop.f32.mrb[15].mxu0  ;;  %2880 = vmatmul.mubr.f32.vlgmr.msra.gmra.mrb[32].mxu0 %v2106_v4 }
 0xdf5   :  { %v2176_v6 = vpop.f32.mrb[32].mxu0 }
 0xdf6   :  { %v2881_v7 = vpop.f32.mrb[33].mxu0  ;;  %2887 = vmatmul.mubr.msk.f32.vlgmr.msra.gmra.mrb[22].mxu1 %vm2036_vm6, %v2176_v6 }
 0xec9   :  { %v2255_v1 = vpop.f32.mrb[22].mxu1 }
 0xeca   :  { %v2256_v10 = vadd.f32 %v2403_v8, %v2255_v1  ;;  %v2888_v14 = vpop.f32.mrb[23].mxu1 }
 0xecc   :  { %2260 = vst.msk [vmem:[%s3931_s19] sm:$0x3] %vm2259_vm7, %v2256_v10 }
 0xecd   :  { %2265 = vsyncpa [#allocation4], 1 }
 0xece   :  { %2266 = vsyncpa [#allocation6], 1 }
 0xecf   :  { %2267 = vsyncpa [#allocation9], 1 }
 0xed0   :  { %2268 = vsyncpa [#allocation12], 1 }

</bundles_post_ra>
